<compile_context>
chip_gen: v5e
topology: v5e:2x2
jax: 0.10.0
libtpu: 0.0.40
codegen_flags: <defaults>
</compile_context>

<pallas_src>
import functools

import jax
import jax.numpy as jnp
import numpy as np
from jax.experimental import pallas as pl
from jax.experimental.pallas import tpu as pltpu


# -----------------------------------------------------------------------------
# Fused kernel: all 4 convs + ReLU + InstanceNorm for one batch sample.
# -----------------------------------------------------------------------------
def _dense_block_kernel(x_ref, col_ref, w1_ref, w2_ref, w3_ref, w4_ref, scal_ref,
                        o_ref, taps_ref, *, H, W, C, eps, act):
    HW = H * W
    n_taps = 9
    tdt = taps_ref.dtype

    # Exact wrap-column masks from a host-precomputed int32 column index.
    col = col_ref[...]                      # (1, HW), w coordinate of each lane
    first_col = col == 0                    # w == 0
    last_col = col == (W - 1)               # w == W-1

    def store_taps(src_f32, slot):
        """Write the 9 circularly shifted copies of src (C,HW) into scratch slot."""
        base = slot * n_taps * C
        t0 = src_f32
        # dw = -1 / +1: flat lane roll for the interior + masked fix at the
        # W-wrap column (fp32 datapath; cast only at the scratch store).
        t_wm1 = jnp.where(first_col,
                          pltpu.roll(t0, HW - W + 1, axis=1),   # w=0 takes w=W-1 (same row)
                          pltpu.roll(t0, 1, axis=1))            # dw = -1
        t_wp1 = jnp.where(last_col,
                          pltpu.roll(t0, W - 1, axis=1),        # w=W-1 takes w=0 (same row)
                          pltpu.roll(t0, HW - 1, axis=1))       # dw = +1
        by_dw = (t_wm1, t0, t_wp1)
        for kh in range(3):                                     # dh = kh - 1
            dh = kh - 1
            row_shift = (-dh * W) % HW                          # whole-row roll == circular H shift
            for kw in range(3):                                 # dw = kw - 1
                s = by_dw[kw]
                if row_shift:
                    s = pltpu.roll(s, row_shift, axis=1)
                taps_ref[pl.ds(base + (kh * 3 + kw) * C, C), :] = s.astype(tdt)

    def conv_layer(w_ref, layer_idx, n_src, act_norm):
        # ONE MXU dot per layer: (C, n_src*9*C) x (n_src*9*C, HW) -> (C, HW) fp32.
        k_len = n_src * n_taps * C
        y = jnp.dot(w_ref[...], taps_ref[pl.ds(0, k_len), :],
                    preferred_element_type=jnp.float32)
        y = y + scal_ref[3 * layer_idx + 0]                     # bias (C, 1), fp32
        if act_norm:
            if act == "lrelu":
                y = jnp.where(y >= 0.0, y, 0.2 * y)
            else:
                y = jnp.maximum(y, 0.0)                         # ReLU
            # Two-pass InstanceNorm stats (biased variance), all in fp32.
            mean = jnp.mean(y, axis=1, keepdims=True)           # (C, 1)
            d = y - mean
            var = jnp.mean(d * d, axis=1, keepdims=True)
            y = d * jax.lax.rsqrt(var + eps)
            y = y * scal_ref[3 * layer_idx + 1] + scal_ref[3 * layer_idx + 2]
        return y

    x = x_ref[0].astype(jnp.float32)                            # (C, HW)
    store_taps(x, 0)                                            # scratch slot 0: x
    x1 = conv_layer(w1_ref, 0, 1, True)
    store_taps(x1, 1)                                           # slot 1: x1
    x2 = conv_layer(w2_ref, 1, 2, True)
    store_taps(x2, 2)                                           # slot 2: x2
    x3 = conv_layer(w3_ref, 2, 3, True)
    store_taps(x3, 3)                                           # slot 3: x3
    out = conv_layer(w4_ref, 3, 4, False)                       # conv4: no act/norm

    o_ref[0] = out.astype(o_ref.dtype)


# -----------------------------------------------------------------------------
# Wrapper: one pallas_call for the whole dense block.
# -----------------------------------------------------------------------------
def _vmem_limit_bytes():
    # 3/4 of physical VMEM: ~96 MiB on v5e/v6e (128 MiB), ~48 MiB on v7x (64 MiB).
    try:
        cap = getattr(pltpu.get_tpu_info(), "vmem_capacity_bytes", None)
        if cap:
            return int(cap) * 3 // 4
    except Exception:
        pass
    return 48 * 1024 * 1024


def conv_block_ine_dense(x_nchw, params, *, ksize=3, act="relu", eps=1e-5):
    """Fused forward pass of ConvBlockINEDense.  x_nchw: (N, C, H, W)."""
    assert ksize == 3, "Pallas kernel is specialized to the module default ksize=3."
    N, C, H, W = x_nchw.shape
    HW = H * W
    n_taps = ksize * ksize
    x2d = x_nchw.reshape(N, C, HW)
    col_idx = (jnp.arange(HW, dtype=jnp.int32) % W).reshape(1, HW)
    taps_dtype = x2d.dtype

    kernel = functools.partial(_dense_block_kernel, H=H, W=W, C=C, eps=eps, act=act)

    itemsize = jnp.dtype(x2d.dtype).itemsize
    w_bytes = sum(int(np.prod(params[k].shape)) * jnp.dtype(params[k].dtype).itemsize
                  for k in ("w1", "w2", "w3", "w4"))
    cost = pl.CostEstimate(
        flops=int(2 * 90 * C * C * HW * N),                     # 90 = (1+2+3+4)*9 taps
        transcendentals=int(3 * C * N),                         # rsqrt per norm channel
        bytes_accessed=int(2 * N * C * HW * itemsize + w_bytes + 12 * C * 4 + HW * 4),
    )

    out = pl.pallas_call(
        kernel,
        out_shape=jax.ShapeDtypeStruct((N, C, HW), x2d.dtype),
        grid_spec=pltpu.PrefetchScalarGridSpec(
            num_scalar_prefetch=0,
            grid=(N,),
            in_specs=[
                pl.BlockSpec((1, C, HW), lambda n: (n, 0, 0)),              # x, per sample
                pl.BlockSpec((1, HW), lambda n: (0, 0)),                    # column index (resident)
                pl.BlockSpec((C, 1 * n_taps * C), lambda n: (0, 0)),        # w1 (resident)
                pl.BlockSpec((C, 2 * n_taps * C), lambda n: (0, 0)),        # w2 (resident)
                pl.BlockSpec((C, 3 * n_taps * C), lambda n: (0, 0)),        # w3 (resident)
                pl.BlockSpec((C, 4 * n_taps * C), lambda n: (0, 0)),        # w4 (resident)
                pl.BlockSpec((12, C, 1), lambda n: (0, 0, 0)),              # bias/gamma/beta
            ],
            out_specs=pl.BlockSpec((1, C, HW), lambda n: (n, 0, 0)),
            scratch_shapes=[pltpu.VMEM((4 * n_taps * C, HW), taps_dtype)],  # stacked taps
        ),
        compiler_params=pltpu.CompilerParams(
            # Independent batch axis -> shards across v7x's two TensorCores.
            dimension_semantics=("parallel",),
            vmem_limit_bytes=_vmem_limit_bytes(),
        ),
        cost_estimate=cost,
    )(x2d, col_idx, params["w1"], params["w2"], params["w3"], params["w4"], params["scal"])
    return out.reshape(N, C, H, W)


# -----------------------------------------------------------------------------
# Parameter packing (PyTorch OIHW conv weights -> kernel layout).
# -----------------------------------------------------------------------------
def _pack_conv_weight(w_oihw, n_src, C, ksize):
    # (Cout, n_src*C, kh, kw) with PyTorch concat order (newest source first)
    # -> lane-dense (Cout, n_src*kh*kw*C) with sources ordered OLDEST first
    # (x, x1, x2, x3) to match the incremental tap scratch layout.
    Cout = w_oihw.shape[0]
    w = w_oihw.reshape(Cout, n_src, C, ksize, ksize)
    w = w[:, ::-1]                                       # newest-first -> oldest-first
    w = jnp.transpose(w, (0, 1, 3, 4, 2))                # (Cout, src, kh, kw, Cin_local)
    return w.reshape(Cout, n_src * ksize * ksize * C)


def pack_params(raw, n_ch, ksize=3):
    C = n_ch
    ones = jnp.ones((C,), jnp.float32)
    zeros = jnp.zeros((C,), jnp.float32)
    scal = jnp.stack([raw["b1"], raw["g1"], raw["be1"],
                      raw["b2"], raw["g2"], raw["be2"],
                      raw["b3"], raw["g3"], raw["be3"],
                      raw["b4"], ones, zeros], axis=0)
    return {
        "w1": _pack_conv_weight(raw["w1"], 1, C, ksize),
        "w2": _pack_conv_weight(raw["w2"], 2, C, ksize),
        "w3": _pack_conv_weight(raw["w3"], 3, C, ksize),
        "w4": _pack_conv_weight(raw["w4"], 4, C, ksize),
        "scal": scal.astype(jnp.float32).reshape(12, C, 1),
    }


def init_params(key, n_ch, ksize=3):
    ks = jax.random.split(key, 14)

    def wconv(k, cin):  # PyTorch OIHW layout
        return (0.1 * jax.random.normal(k, (n_ch, cin, ksize, ksize))).astype(jnp.float32)

    def vec(k):
        return (0.1 * jax.random.normal(k, (n_ch,))).astype(jnp.float32)

    raw = {
        "w1": wconv(ks[0], n_ch),      "b1": vec(ks[1]),
        "w2": wconv(ks[2], 2 * n_ch),  "b2": vec(ks[3]),
        "w3": wconv(ks[4], 3 * n_ch),  "b3": vec(ks[5]),
        "w4": wconv(ks[6], 4 * n_ch),  "b4": vec(ks[7]),
        "g1": 1.0 + vec(ks[8]),  "be1": vec(ks[9]),
        "g2": 1.0 + vec(ks[10]), "be2": vec(ks[11]),
        "g3": 1.0 + vec(ks[12]), "be3": vec(ks[13]),
    }
    return pack_params(raw, n_ch, ksize), raw


# -----------------------------------------------------------------------------
# Pure-JAX reference (NCHW, circular padding, biased-variance InstanceNorm).
# -----------------------------------------------------------------------------
def _ref_block(x, raw, ksize=3, act="relu", eps=1e-5):
    pad = (ksize - 1) // 2

    def conv(inp, w, b):
        xp = jnp.pad(inp, ((0, 0), (0, 0), (pad, pad), (pad, pad)), mode="wrap")
        y = jax.lax.conv_general_dilated(
            xp, w, window_strides=(1, 1), padding="VALID",
            dimension_numbers=("NCHW", "OIHW", "NCHW"),
            precision=jax.lax.Precision.HIGHEST)
        return y + b.reshape(1, -1, 1, 1)

    def actf(y):
        if act == "lrelu":
            return jnp.where(y >= 0, y, 0.2 * y)
        return jnp.maximum(y, 0.0)

    def inorm(y, g, b):
        m = y.mean(axis=(2, 3), keepdims=True)
        v = ((y - m) ** 2).mean(axis=(2, 3), keepdims=True)
        return (y - m) * jax.lax.rsqrt(v + eps) * g.reshape(1, -1, 1, 1) + b.reshape(1, -1, 1, 1)

    x1 = inorm(actf(conv(x, raw["w1"], raw["b1"])), raw["g1"], raw["be1"])
    x2 = inorm(actf(conv(jnp.concatenate([x1, x], 1), raw["w2"], raw["b2"])),
               raw["g2"], raw["be2"])
    x3 = inorm(actf(conv(jnp.concatenate([x2, x1, x], 1), raw["w3"], raw["b3"])),
               raw["g3"], raw["be3"])
    return conv(jnp.concatenate([x3, x2, x1, x], 1), raw["w4"], raw["b4"])


if __name__ == "__main__":
    N, C, H, W = 2, 4, 16, 16            # PyTorch-style NCHW input
    key = jax.random.PRNGKey(0)
    kx, kp = jax.random.split(key)

    x = jax.random.normal(kx, (N, C, H, W), dtype=jnp.float32)
    params, raw = init_params(kp, C, ksize=3)

    fwd = jax.jit(conv_block_ine_dense)
    out = jax.block_until_ready(fwd(x, params))                # (N, C, H, W)

    ref = jax.block_until_ready(_ref_block(x, raw, ksize=3))
    np.testing.assert_allclose(np.asarray(out), np.asarray(ref),
                               rtol=1e-3, atol=1e-3)

    # bf16 storage path (v6e / v7x): bf16 activations + weights in HBM / MXU,
    # fp32 roll/select datapath, fp32 accumulation and InstanceNorm stats.
    params_bf16 = dict(params)
    for k in ("w1", "w2", "w3", "w4"):
        params_bf16[k] = params[k].astype(jnp.bfloat16)
    out_bf16 = jax.block_until_ready(
        conv_block_ine_dense(x.astype(jnp.bfloat16), params_bf16))
    assert out_bf16.dtype == jnp.bfloat16
    err = float(np.max(np.abs(np.asarray(out_bf16, dtype=np.float32) - np.asarray(ref))))
    assert np.isfinite(err) and err < 0.3, f"bf16 path error too large: {err}"

    print("KERNEL_OK")
</pallas_src>

<mosaic_0001>
module attributes {stable_mosaic.version = 11 : i64} {
  func.func @_dense_block_kernel(%arg0: i32, %arg1: memref<1x4x256xf32, #tpu.memory_space<vmem>>, %arg2: memref<1x256xi32, #tpu.memory_space<vmem>>, %arg3: memref<4x36xf32, #tpu.memory_space<vmem>>, %arg4: memref<4x72xf32, #tpu.memory_space<vmem>>, %arg5: memref<4x108xf32, #tpu.memory_space<vmem>>, %arg6: memref<4x144xf32, #tpu.memory_space<vmem>>, %arg7: memref<12x4x1xf32, #tpu.memory_space<vmem>>, %arg8: memref<1x4x256xf32, #tpu.memory_space<vmem>>, %arg9: memref<144x256xf32, #tpu.memory_space<vmem>>) attributes {dimension_semantics = [#tpu.dimension_semantics<parallel>], iteration_bounds = array<i64: 2>, scalar_prefetch = 0 : i64, scratch_operands = 1 : i64, tpu.core_type = #tpu.core_type<tc>, window_params = [{transform_indices = @transform_0, window_bounds = array<i64: 1, 4, 256>}, {pipeline_mode = #tpu.pipeline_mode<synchronous>, transform_indices = @transform_1, window_bounds = array<i64: 1, 256>}, {pipeline_mode = #tpu.pipeline_mode<synchronous>, transform_indices = @transform_2, window_bounds = array<i64: 4, 36>}, {pipeline_mode = #tpu.pipeline_mode<synchronous>, transform_indices = @transform_3, window_bounds = array<i64: 4, 72>}, {pipeline_mode = #tpu.pipeline_mode<synchronous>, transform_indices = @transform_4, window_bounds = array<i64: 4, 108>}, {pipeline_mode = #tpu.pipeline_mode<synchronous>, transform_indices = @transform_5, window_bounds = array<i64: 4, 144>}, {pipeline_mode = #tpu.pipeline_mode<synchronous>, transform_indices = @transform_6, window_bounds = array<i64: 12, 4, 1>}, {transform_indices = @transform_7, window_bounds = array<i64: 1, 4, 256>}]} {
    %c0 = arith.constant 0 : index
    %c0_0 = arith.constant 0 : index
    %0 = vector.load %arg2[%c0, %c0_0] : memref<1x256xi32, #tpu.memory_space<vmem>>, vector<1x256xi32>
    %c0_i32 = arith.constant 0 : i32
    %1 = vector.broadcast %c0_i32 : i32 to vector<1x256xi32>
    %2 = arith.cmpi eq, %0, %1 : vector<1x256xi32>
    %c15_i32 = arith.constant 15 : i32
    %3 = vector.broadcast %c15_i32 : i32 to vector<1x256xi32>
    %4 = arith.cmpi eq, %0, %3 : vector<1x256xi32>
    %c0_1 = arith.constant 0 : index
    %c0_2 = arith.constant 0 : index
    %c0_3 = arith.constant 0 : index
    %5 = vector.load %arg1[%c0_1, %c0_2, %c0_3] : memref<1x4x256xf32, #tpu.memory_space<vmem>>, vector<1x4x256xf32>
    %6 = vector.shape_cast %5 : vector<1x4x256xf32> to vector<4x256xf32>
    %c241_i32 = arith.constant 241 : i32
    %7 = tpu.dynamic_rotate %6 by %c241_i32 dim 1 : vector<4x256xf32>, i32 -> vector<4x256xf32>
    %c1_i32 = arith.constant 1 : i32
    %8 = tpu.dynamic_rotate %6 by %c1_i32 dim 1 : vector<4x256xf32>, i32 -> vector<4x256xf32>
    %9 = vector.shape_cast %2 : vector<1x256xi1> to vector<1x256xi1>
    %10 = vector.broadcast %9 : vector<1x256xi1> to vector<4x256xi1>
    %11 = arith.select %10, %7, %8 : vector<4x256xi1>, vector<4x256xf32>
    %c15_i32_4 = arith.constant 15 : i32
    %12 = tpu.dynamic_rotate %6 by %c15_i32_4 dim 1 : vector<4x256xf32>, i32 -> vector<4x256xf32>
    %c255_i32 = arith.constant 255 : i32
    %13 = tpu.dynamic_rotate %6 by %c255_i32 dim 1 : vector<4x256xf32>, i32 -> vector<4x256xf32>
    %14 = vector.shape_cast %4 : vector<1x256xi1> to vector<1x256xi1>
    %15 = vector.broadcast %14 : vector<1x256xi1> to vector<4x256xi1>
    %16 = arith.select %15, %12, %13 : vector<4x256xi1>, vector<4x256xf32>
    %c16_i32 = arith.constant 16 : i32
    %17 = tpu.dynamic_rotate %11 by %c16_i32 dim 1 : vector<4x256xf32>, i32 -> vector<4x256xf32>
    %c0_5 = arith.constant 0 : index
    %c0_6 = arith.constant 0 : index
    %18 = vector.load %arg9[%c0_5, %c0_6] : memref<144x256xf32, #tpu.memory_space<vmem>>, vector<4x256xf32>
    tpu.vector_store %arg9[%c0_5, %c0_6], %17 {strides = array<i32>} : memref<144x256xf32, #tpu.memory_space<vmem>>, vector<4x256xf32>,
    %c16_i32_7 = arith.constant 16 : i32
    %19 = tpu.dynamic_rotate %6 by %c16_i32_7 dim 1 : vector<4x256xf32>, i32 -> vector<4x256xf32>
    %c4 = arith.constant 4 : index
    %c0_8 = arith.constant 0 : index
    %20 = vector.load %arg9[%c4, %c0_8] : memref<144x256xf32, #tpu.memory_space<vmem>>, vector<4x256xf32>
    tpu.vector_store %arg9[%c4, %c0_8], %19 {strides = array<i32>} : memref<144x256xf32, #tpu.memory_space<vmem>>, vector<4x256xf32>,
    %c16_i32_9 = arith.constant 16 : i32
    %21 = tpu.dynamic_rotate %16 by %c16_i32_9 dim 1 : vector<4x256xf32>, i32 -> vector<4x256xf32>
    %c8 = arith.constant 8 : index
    %c0_10 = arith.constant 0 : index
    %22 = vector.load %arg9[%c8, %c0_10] : memref<144x256xf32, #tpu.memory_space<vmem>>, vector<4x256xf32>
    tpu.vector_store %arg9[%c8, %c0_10], %21 {strides = array<i32>} : memref<144x256xf32, #tpu.memory_space<vmem>>, vector<4x256xf32>,
    %c12 = arith.constant 12 : index
    %c0_11 = arith.constant 0 : index
    %23 = vector.load %arg9[%c12, %c0_11] : memref<144x256xf32, #tpu.memory_space<vmem>>, vector<4x256xf32>
    tpu.vector_store %arg9[%c12, %c0_11], %11 {strides = array<i32>} : memref<144x256xf32, #tpu.memory_space<vmem>>, vector<4x256xf32>,
    %c16 = arith.constant 16 : index
    %c0_12 = arith.constant 0 : index
    %24 = vector.load %arg9[%c16, %c0_12] : memref<144x256xf32, #tpu.memory_space<vmem>>, vector<4x256xf32>
    tpu.vector_store %arg9[%c16, %c0_12], %6 {strides = array<i32>} : memref<144x256xf32, #tpu.memory_space<vmem>>, vector<4x256xf32>,
    %c20 = arith.constant 20 : index
    %c0_13 = arith.constant 0 : index
    %25 = vector.load %arg9[%c20, %c0_13] : memref<144x256xf32, #tpu.memory_space<vmem>>, vector<4x256xf32>
    tpu.vector_store %arg9[%c20, %c0_13], %16 {strides = array<i32>} : memref<144x256xf32, #tpu.memory_space<vmem>>, vector<4x256xf32>,
    %c240_i32 = arith.constant 240 : i32
    %26 = tpu.dynamic_rotate %11 by %c240_i32 dim 1 : vector<4x256xf32>, i32 -> vector<4x256xf32>
    %c24 = arith.constant 24 : index
    %c0_14 = arith.constant 0 : index
    %27 = vector.load %arg9[%c24, %c0_14] : memref<144x256xf32, #tpu.memory_space<vmem>>, vector<4x256xf32>
    tpu.vector_store %arg9[%c24, %c0_14], %26 {strides = array<i32>} : memref<144x256xf32, #tpu.memory_space<vmem>>, vector<4x256xf32>,
    %c240_i32_15 = arith.constant 240 : i32
    %28 = tpu.dynamic_rotate %6 by %c240_i32_15 dim 1 : vector<4x256xf32>, i32 -> vector<4x256xf32>
    %c28 = arith.constant 28 : index
    %c0_16 = arith.constant 0 : index
    %29 = vector.load %arg9[%c28, %c0_16] : memref<144x256xf32, #tpu.memory_space<vmem>>, vector<4x256xf32>
    tpu.vector_store %arg9[%c28, %c0_16], %28 {strides = array<i32>} : memref<144x256xf32, #tpu.memory_space<vmem>>, vector<4x256xf32>,
    %c240_i32_17 = arith.constant 240 : i32
    %30 = tpu.dynamic_rotate %16 by %c240_i32_17 dim 1 : vector<4x256xf32>, i32 -> vector<4x256xf32>
    %c32 = arith.constant 32 : index
    %c0_18 = arith.constant 0 : index
    %31 = vector.load %arg9[%c32, %c0_18] : memref<144x256xf32, #tpu.memory_space<vmem>>, vector<4x256xf32>
    tpu.vector_store %arg9[%c32, %c0_18], %30 {strides = array<i32>} : memref<144x256xf32, #tpu.memory_space<vmem>>, vector<4x256xf32>,
    %c0_19 = arith.constant 0 : index
    %c0_20 = arith.constant 0 : index
    %32 = vector.load %arg3[%c0_19, %c0_20] : memref<4x36xf32, #tpu.memory_space<vmem>>, vector<4x36xf32>
    %c0_21 = arith.constant 0 : index
    %c0_22 = arith.constant 0 : index
    %33 = vector.load %arg9[%c0_21, %c0_22] : memref<144x256xf32, #tpu.memory_space<vmem>>, vector<36x256xf32>
    %cst = arith.constant dense<0.000000e+00> : vector<4x256xf32>
    %34 = tpu.matmul %32, %33, %cst {dimension_numbers = #tpu.dot_dimension_numbers<[1], [0], [0], [1], [0, 0, 1, 1], [], []>} : vector<4x36xf32>, vector<36x256xf32>, vector<4x256xf32> -> vector<4x256xf32>
    %c0_23 = arith.constant 0 : index
    %c0_24 = arith.constant 0 : index
    %c0_25 = arith.constant 0 : index
    %35 = vector.load %arg7[%c0_23, %c0_24, %c0_25] : memref<12x4x1xf32, #tpu.memory_space<vmem>>, vector<1x4x1xf32>
    %36 = vector.shape_cast %35 : vector<1x4x1xf32> to vector<4x1xf32>
    %37 = vector.broadcast %36 : vector<4x1xf32> to vector<4x256xf32>
    %38 = arith.addf %34, %37 : vector<4x256xf32>
    %cst_26 = arith.constant 0.000000e+00 : f32
    %39 = vector.broadcast %cst_26 : f32 to vector<4x256xf32>
    %40 = arith.maximumf %38, %39 : vector<4x256xf32>
    %cst_27 = arith.constant dense<0.000000e+00> : vector<4xf32>
    %41 = vector.multi_reduction <add>, %40, %cst_27 [1] : vector<4x256xf32> to vector<4xf32>
    %42 = vector.shape_cast %41 : vector<4xf32> to vector<4x1xf32>
    %cst_28 = arith.constant 2.560000e+02 : f32
    %43 = vector.broadcast %cst_28 : f32 to vector<4x1xf32>
    %44 = arith.divf %42, %43 : vector<4x1xf32>
    %45 = vector.broadcast %44 : vector<4x1xf32> to vector<4x256xf32>
    %46 = arith.subf %40, %45 : vector<4x256xf32>
    %47 = arith.mulf %46, %46 : vector<4x256xf32>
    %cst_29 = arith.constant dense<0.000000e+00> : vector<4xf32>
    %48 = vector.multi_reduction <add>, %47, %cst_29 [1] : vector<4x256xf32> to vector<4xf32>
    %49 = vector.shape_cast %48 : vector<4xf32> to vector<4x1xf32>
    %cst_30 = arith.constant 2.560000e+02 : f32
    %50 = vector.broadcast %cst_30 : f32 to vector<4x1xf32>
    %51 = arith.divf %49, %50 : vector<4x1xf32>
    %cst_31 = arith.constant 9.99999974E-6 : f32
    %52 = vector.broadcast %cst_31 : f32 to vector<4x1xf32>
    %53 = arith.addf %51, %52 : vector<4x1xf32>
    %54 = math.rsqrt %53 : vector<4x1xf32>
    %55 = vector.broadcast %54 : vector<4x1xf32> to vector<4x256xf32>
    %56 = arith.mulf %46, %55 : vector<4x256xf32>
    %c1 = arith.constant 1 : index
    %c0_32 = arith.constant 0 : index
    %c0_33 = arith.constant 0 : index
    %57 = vector.load %arg7[%c1, %c0_32, %c0_33] : memref<12x4x1xf32, #tpu.memory_space<vmem>>, vector<1x4x1xf32>
    %58 = vector.shape_cast %57 : vector<1x4x1xf32> to vector<4x1xf32>
    %59 = vector.broadcast %58 : vector<4x1xf32> to vector<4x256xf32>
    %60 = arith.mulf %56, %59 : vector<4x256xf32>
    %c2 = arith.constant 2 : index
    %c0_34 = arith.constant 0 : index
    %c0_35 = arith.constant 0 : index
    %61 = vector.load %arg7[%c2, %c0_34, %c0_35] : memref<12x4x1xf32, #tpu.memory_space<vmem>>, vector<1x4x1xf32>
    %62 = vector.shape_cast %61 : vector<1x4x1xf32> to vector<4x1xf32>
    %63 = vector.broadcast %62 : vector<4x1xf32> to vector<4x256xf32>
    %64 = arith.addf %60, %63 : vector<4x256xf32>
    %c241_i32_36 = arith.constant 241 : i32
    %65 = tpu.dynamic_rotate %64 by %c241_i32_36 dim 1 : vector<4x256xf32>, i32 -> vector<4x256xf32>
    %c1_i32_37 = arith.constant 1 : i32
    %66 = tpu.dynamic_rotate %64 by %c1_i32_37 dim 1 : vector<4x256xf32>, i32 -> vector<4x256xf32>
    %67 = vector.shape_cast %2 : vector<1x256xi1> to vector<1x256xi1>
    %68 = vector.broadcast %67 : vector<1x256xi1> to vector<4x256xi1>
    %69 = arith.select %68, %65, %66 : vector<4x256xi1>, vector<4x256xf32>
    %c15_i32_38 = arith.constant 15 : i32
    %70 = tpu.dynamic_rotate %64 by %c15_i32_38 dim 1 : vector<4x256xf32>, i32 -> vector<4x256xf32>
    %c255_i32_39 = arith.constant 255 : i32
    %71 = tpu.dynamic_rotate %64 by %c255_i32_39 dim 1 : vector<4x256xf32>, i32 -> vector<4x256xf32>
    %72 = vector.shape_cast %4 : vector<1x256xi1> to vector<1x256xi1>
    %73 = vector.broadcast %72 : vector<1x256xi1> to vector<4x256xi1>
    %74 = arith.select %73, %70, %71 : vector<4x256xi1>, vector<4x256xf32>
    %c16_i32_40 = arith.constant 16 : i32
    %75 = tpu.dynamic_rotate %69 by %c16_i32_40 dim 1 : vector<4x256xf32>, i32 -> vector<4x256xf32>
    %c36 = arith.constant 36 : index
    %c0_41 = arith.constant 0 : index
    %76 = vector.load %arg9[%c36, %c0_41] : memref<144x256xf32, #tpu.memory_space<vmem>>, vector<4x256xf32>
    tpu.vector_store %arg9[%c36, %c0_41], %75 {strides = array<i32>} : memref<144x256xf32, #tpu.memory_space<vmem>>, vector<4x256xf32>,
    %c16_i32_42 = arith.constant 16 : i32
    %77 = tpu.dynamic_rotate %64 by %c16_i32_42 dim 1 : vector<4x256xf32>, i32 -> vector<4x256xf32>
    %c40 = arith.constant 40 : index
    %c0_43 = arith.constant 0 : index
    %78 = vector.load %arg9[%c40, %c0_43] : memref<144x256xf32, #tpu.memory_space<vmem>>, vector<4x256xf32>
    tpu.vector_store %arg9[%c40, %c0_43], %77 {strides = array<i32>} : memref<144x256xf32, #tpu.memory_space<vmem>>, vector<4x256xf32>,
    %c16_i32_44 = arith.constant 16 : i32
    %79 = tpu.dynamic_rotate %74 by %c16_i32_44 dim 1 : vector<4x256xf32>, i32 -> vector<4x256xf32>
    %c44 = arith.constant 44 : index
    %c0_45 = arith.constant 0 : index
    %80 = vector.load %arg9[%c44, %c0_45] : memref<144x256xf32, #tpu.memory_space<vmem>>, vector<4x256xf32>
    tpu.vector_store %arg9[%c44, %c0_45], %79 {strides = array<i32>} : memref<144x256xf32, #tpu.memory_space<vmem>>, vector<4x256xf32>,
    %c48 = arith.constant 48 : index
    %c0_46 = arith.constant 0 : index
    %81 = vector.load %arg9[%c48, %c0_46] : memref<144x256xf32, #tpu.memory_space<vmem>>, vector<4x256xf32>
    tpu.vector_store %arg9[%c48, %c0_46], %69 {strides = array<i32>} : memref<144x256xf32, #tpu.memory_space<vmem>>, vector<4x256xf32>,
    %c52 = arith.constant 52 : index
    %c0_47 = arith.constant 0 : index
    %82 = vector.load %arg9[%c52, %c0_47] : memref<144x256xf32, #tpu.memory_space<vmem>>, vector<4x256xf32>
    tpu.vector_store %arg9[%c52, %c0_47], %64 {strides = array<i32>} : memref<144x256xf32, #tpu.memory_space<vmem>>, vector<4x256xf32>,
    %c56 = arith.constant 56 : index
    %c0_48 = arith.constant 0 : index
    %83 = vector.load %arg9[%c56, %c0_48] : memref<144x256xf32, #tpu.memory_space<vmem>>, vector<4x256xf32>
    tpu.vector_store %arg9[%c56, %c0_48], %74 {strides = array<i32>} : memref<144x256xf32, #tpu.memory_space<vmem>>, vector<4x256xf32>,
    %c240_i32_49 = arith.constant 240 : i32
    %84 = tpu.dynamic_rotate %69 by %c240_i32_49 dim 1 : vector<4x256xf32>, i32 -> vector<4x256xf32>
    %c60 = arith.constant 60 : index
    %c0_50 = arith.constant 0 : index
    %85 = vector.load %arg9[%c60, %c0_50] : memref<144x256xf32, #tpu.memory_space<vmem>>, vector<4x256xf32>
    tpu.vector_store %arg9[%c60, %c0_50], %84 {strides = array<i32>} : memref<144x256xf32, #tpu.memory_space<vmem>>, vector<4x256xf32>,
    %c240_i32_51 = arith.constant 240 : i32
    %86 = tpu.dynamic_rotate %64 by %c240_i32_51 dim 1 : vector<4x256xf32>, i32 -> vector<4x256xf32>
    %c64 = arith.constant 64 : index
    %c0_52 = arith.constant 0 : index
    %87 = vector.load %arg9[%c64, %c0_52] : memref<144x256xf32, #tpu.memory_space<vmem>>, vector<4x256xf32>
    tpu.vector_store %arg9[%c64, %c0_52], %86 {strides = array<i32>} : memref<144x256xf32, #tpu.memory_space<vmem>>, vector<4x256xf32>,
    %c240_i32_53 = arith.constant 240 : i32
    %88 = tpu.dynamic_rotate %74 by %c240_i32_53 dim 1 : vector<4x256xf32>, i32 -> vector<4x256xf32>
    %c68 = arith.constant 68 : index
    %c0_54 = arith.constant 0 : index
    %89 = vector.load %arg9[%c68, %c0_54] : memref<144x256xf32, #tpu.memory_space<vmem>>, vector<4x256xf32>
    tpu.vector_store %arg9[%c68, %c0_54], %88 {strides = array<i32>} : memref<144x256xf32, #tpu.memory_space<vmem>>, vector<4x256xf32>,
    %c0_55 = arith.constant 0 : index
    %c0_56 = arith.constant 0 : index
    %90 = vector.load %arg4[%c0_55, %c0_56] : memref<4x72xf32, #tpu.memory_space<vmem>>, vector<4x72xf32>
    %c0_57 = arith.constant 0 : index
    %c0_58 = arith.constant 0 : index
    %91 = vector.load %arg9[%c0_57, %c0_58] : memref<144x256xf32, #tpu.memory_space<vmem>>, vector<72x256xf32>
    %cst_59 = arith.constant dense<0.000000e+00> : vector<4x256xf32>
    %92 = tpu.matmul %90, %91, %cst_59 {dimension_numbers = #tpu.dot_dimension_numbers<[1], [0], [0], [1], [0, 0, 1, 1], [], []>} : vector<4x72xf32>, vector<72x256xf32>, vector<4x256xf32> -> vector<4x256xf32>
    %c3 = arith.constant 3 : index
    %c0_60 = arith.constant 0 : index
    %c0_61 = arith.constant 0 : index
    %93 = vector.load %arg7[%c3, %c0_60, %c0_61] : memref<12x4x1xf32, #tpu.memory_space<vmem>>, vector<1x4x1xf32>
    %94 = vector.shape_cast %93 : vector<1x4x1xf32> to vector<4x1xf32>
    %95 = vector.broadcast %94 : vector<4x1xf32> to vector<4x256xf32>
    %96 = arith.addf %92, %95 : vector<4x256xf32>
    %cst_62 = arith.constant 0.000000e+00 : f32
    %97 = vector.broadcast %cst_62 : f32 to vector<4x256xf32>
    %98 = arith.maximumf %96, %97 : vector<4x256xf32>
    %cst_63 = arith.constant dense<0.000000e+00> : vector<4xf32>
    %99 = vector.multi_reduction <add>, %98, %cst_63 [1] : vector<4x256xf32> to vector<4xf32>
    %100 = vector.shape_cast %99 : vector<4xf32> to vector<4x1xf32>
    %cst_64 = arith.constant 2.560000e+02 : f32
    %101 = vector.broadcast %cst_64 : f32 to vector<4x1xf32>
    %102 = arith.divf %100, %101 : vector<4x1xf32>
    %103 = vector.broadcast %102 : vector<4x1xf32> to vector<4x256xf32>
    %104 = arith.subf %98, %103 : vector<4x256xf32>
    %105 = arith.mulf %104, %104 : vector<4x256xf32>
    %cst_65 = arith.constant dense<0.000000e+00> : vector<4xf32>
    %106 = vector.multi_reduction <add>, %105, %cst_65 [1] : vector<4x256xf32> to vector<4xf32>
    %107 = vector.shape_cast %106 : vector<4xf32> to vector<4x1xf32>
    %cst_66 = arith.constant 2.560000e+02 : f32
    %108 = vector.broadcast %cst_66 : f32 to vector<4x1xf32>
    %109 = arith.divf %107, %108 : vector<4x1xf32>
    %cst_67 = arith.constant 9.99999974E-6 : f32
    %110 = vector.broadcast %cst_67 : f32 to vector<4x1xf32>
    %111 = arith.addf %109, %110 : vector<4x1xf32>
    %112 = math.rsqrt %111 : vector<4x1xf32>
    %113 = vector.broadcast %112 : vector<4x1xf32> to vector<4x256xf32>
    %114 = arith.mulf %104, %113 : vector<4x256xf32>
    %c4_68 = arith.constant 4 : index
    %c0_69 = arith.constant 0 : index
    %c0_70 = arith.constant 0 : index
    %115 = vector.load %arg7[%c4_68, %c0_69, %c0_70] : memref<12x4x1xf32, #tpu.memory_space<vmem>>, vector<1x4x1xf32>
    %116 = vector.shape_cast %115 : vector<1x4x1xf32> to vector<4x1xf32>
    %117 = vector.broadcast %116 : vector<4x1xf32> to vector<4x256xf32>
    %118 = arith.mulf %114, %117 : vector<4x256xf32>
    %c5 = arith.constant 5 : index
    %c0_71 = arith.constant 0 : index
    %c0_72 = arith.constant 0 : index
    %119 = vector.load %arg7[%c5, %c0_71, %c0_72] : memref<12x4x1xf32, #tpu.memory_space<vmem>>, vector<1x4x1xf32>
    %120 = vector.shape_cast %119 : vector<1x4x1xf32> to vector<4x1xf32>
    %121 = vector.broadcast %120 : vector<4x1xf32> to vector<4x256xf32>
    %122 = arith.addf %118, %121 : vector<4x256xf32>
    %c241_i32_73 = arith.constant 241 : i32
    %123 = tpu.dynamic_rotate %122 by %c241_i32_73 dim 1 : vector<4x256xf32>, i32 -> vector<4x256xf32>
    %c1_i32_74 = arith.constant 1 : i32
    %124 = tpu.dynamic_rotate %122 by %c1_i32_74 dim 1 : vector<4x256xf32>, i32 -> vector<4x256xf32>
    %125 = vector.shape_cast %2 : vector<1x256xi1> to vector<1x256xi1>
    %126 = vector.broadcast %125 : vector<1x256xi1> to vector<4x256xi1>
    %127 = arith.select %126, %123, %124 : vector<4x256xi1>, vector<4x256xf32>
    %c15_i32_75 = arith.constant 15 : i32
    %128 = tpu.dynamic_rotate %122 by %c15_i32_75 dim 1 : vector<4x256xf32>, i32 -> vector<4x256xf32>
    %c255_i32_76 = arith.constant 255 : i32
    %129 = tpu.dynamic_rotate %122 by %c255_i32_76 dim 1 : vector<4x256xf32>, i32 -> vector<4x256xf32>
    %130 = vector.shape_cast %4 : vector<1x256xi1> to vector<1x256xi1>
    %131 = vector.broadcast %130 : vector<1x256xi1> to vector<4x256xi1>
    %132 = arith.select %131, %128, %129 : vector<4x256xi1>, vector<4x256xf32>
    %c16_i32_77 = arith.constant 16 : i32
    %133 = tpu.dynamic_rotate %127 by %c16_i32_77 dim 1 : vector<4x256xf32>, i32 -> vector<4x256xf32>
    %c72 = arith.constant 72 : index
    %c0_78 = arith.constant 0 : index
    %134 = vector.load %arg9[%c72, %c0_78] : memref<144x256xf32, #tpu.memory_space<vmem>>, vector<4x256xf32>
    tpu.vector_store %arg9[%c72, %c0_78], %133 {strides = array<i32>} : memref<144x256xf32, #tpu.memory_space<vmem>>, vector<4x256xf32>,
    %c16_i32_79 = arith.constant 16 : i32
    %135 = tpu.dynamic_rotate %122 by %c16_i32_79 dim 1 : vector<4x256xf32>, i32 -> vector<4x256xf32>
    %c76 = arith.constant 76 : index
    %c0_80 = arith.constant 0 : index
    %136 = vector.load %arg9[%c76, %c0_80] : memref<144x256xf32, #tpu.memory_space<vmem>>, vector<4x256xf32>
    tpu.vector_store %arg9[%c76, %c0_80], %135 {strides = array<i32>} : memref<144x256xf32, #tpu.memory_space<vmem>>, vector<4x256xf32>,
    %c16_i32_81 = arith.constant 16 : i32
    %137 = tpu.dynamic_rotate %132 by %c16_i32_81 dim 1 : vector<4x256xf32>, i32 -> vector<4x256xf32>
    %c80 = arith.constant 80 : index
    %c0_82 = arith.constant 0 : index
    %138 = vector.load %arg9[%c80, %c0_82] : memref<144x256xf32, #tpu.memory_space<vmem>>, vector<4x256xf32>
    tpu.vector_store %arg9[%c80, %c0_82], %137 {strides = array<i32>} : memref<144x256xf32, #tpu.memory_space<vmem>>, vector<4x256xf32>,
    %c84 = arith.constant 84 : index
    %c0_83 = arith.constant 0 : index
    %139 = vector.load %arg9[%c84, %c0_83] : memref<144x256xf32, #tpu.memory_space<vmem>>, vector<4x256xf32>
    tpu.vector_store %arg9[%c84, %c0_83], %127 {strides = array<i32>} : memref<144x256xf32, #tpu.memory_space<vmem>>, vector<4x256xf32>,
    %c88 = arith.constant 88 : index
    %c0_84 = arith.constant 0 : index
    %140 = vector.load %arg9[%c88, %c0_84] : memref<144x256xf32, #tpu.memory_space<vmem>>, vector<4x256xf32>
    tpu.vector_store %arg9[%c88, %c0_84], %122 {strides = array<i32>} : memref<144x256xf32, #tpu.memory_space<vmem>>, vector<4x256xf32>,
    %c92 = arith.constant 92 : index
    %c0_85 = arith.constant 0 : index
    %141 = vector.load %arg9[%c92, %c0_85] : memref<144x256xf32, #tpu.memory_space<vmem>>, vector<4x256xf32>
    tpu.vector_store %arg9[%c92, %c0_85], %132 {strides = array<i32>} : memref<144x256xf32, #tpu.memory_space<vmem>>, vector<4x256xf32>,
    %c240_i32_86 = arith.constant 240 : i32
    %142 = tpu.dynamic_rotate %127 by %c240_i32_86 dim 1 : vector<4x256xf32>, i32 -> vector<4x256xf32>
    %c96 = arith.constant 96 : index
    %c0_87 = arith.constant 0 : index
    %143 = vector.load %arg9[%c96, %c0_87] : memref<144x256xf32, #tpu.memory_space<vmem>>, vector<4x256xf32>
    tpu.vector_store %arg9[%c96, %c0_87], %142 {strides = array<i32>} : memref<144x256xf32, #tpu.memory_space<vmem>>, vector<4x256xf32>,
    %c240_i32_88 = arith.constant 240 : i32
    %144 = tpu.dynamic_rotate %122 by %c240_i32_88 dim 1 : vector<4x256xf32>, i32 -> vector<4x256xf32>
    %c100 = arith.constant 100 : index
    %c0_89 = arith.constant 0 : index
    %145 = vector.load %arg9[%c100, %c0_89] : memref<144x256xf32, #tpu.memory_space<vmem>>, vector<4x256xf32>
    tpu.vector_store %arg9[%c100, %c0_89], %144 {strides = array<i32>} : memref<144x256xf32, #tpu.memory_space<vmem>>, vector<4x256xf32>,
    %c240_i32_90 = arith.constant 240 : i32
    %146 = tpu.dynamic_rotate %132 by %c240_i32_90 dim 1 : vector<4x256xf32>, i32 -> vector<4x256xf32>
    %c104 = arith.constant 104 : index
    %c0_91 = arith.constant 0 : index
    %147 = vector.load %arg9[%c104, %c0_91] : memref<144x256xf32, #tpu.memory_space<vmem>>, vector<4x256xf32>
    tpu.vector_store %arg9[%c104, %c0_91], %146 {strides = array<i32>} : memref<144x256xf32, #tpu.memory_space<vmem>>, vector<4x256xf32>,
    %c0_92 = arith.constant 0 : index
    %c0_93 = arith.constant 0 : index
    %148 = vector.load %arg5[%c0_92, %c0_93] : memref<4x108xf32, #tpu.memory_space<vmem>>, vector<4x108xf32>
    %c0_94 = arith.constant 0 : index
    %c0_95 = arith.constant 0 : index
    %149 = vector.load %arg9[%c0_94, %c0_95] : memref<144x256xf32, #tpu.memory_space<vmem>>, vector<108x256xf32>
    %cst_96 = arith.constant dense<0.000000e+00> : vector<4x256xf32>
    %150 = tpu.matmul %148, %149, %cst_96 {dimension_numbers = #tpu.dot_dimension_numbers<[1], [0], [0], [1], [0, 0, 1, 1], [], []>} : vector<4x108xf32>, vector<108x256xf32>, vector<4x256xf32> -> vector<4x256xf32>
    %c6 = arith.constant 6 : index
    %c0_97 = arith.constant 0 : index
    %c0_98 = arith.constant 0 : index
    %151 = vector.load %arg7[%c6, %c0_97, %c0_98] : memref<12x4x1xf32, #tpu.memory_space<vmem>>, vector<1x4x1xf32>
    %152 = vector.shape_cast %151 : vector<1x4x1xf32> to vector<4x1xf32>
    %153 = vector.broadcast %152 : vector<4x1xf32> to vector<4x256xf32>
    %154 = arith.addf %150, %153 : vector<4x256xf32>
    %cst_99 = arith.constant 0.000000e+00 : f32
    %155 = vector.broadcast %cst_99 : f32 to vector<4x256xf32>
    %156 = arith.maximumf %154, %155 : vector<4x256xf32>
    %cst_100 = arith.constant dense<0.000000e+00> : vector<4xf32>
    %157 = vector.multi_reduction <add>, %156, %cst_100 [1] : vector<4x256xf32> to vector<4xf32>
    %158 = vector.shape_cast %157 : vector<4xf32> to vector<4x1xf32>
    %cst_101 = arith.constant 2.560000e+02 : f32
    %159 = vector.broadcast %cst_101 : f32 to vector<4x1xf32>
    %160 = arith.divf %158, %159 : vector<4x1xf32>
    %161 = vector.broadcast %160 : vector<4x1xf32> to vector<4x256xf32>
    %162 = arith.subf %156, %161 : vector<4x256xf32>
    %163 = arith.mulf %162, %162 : vector<4x256xf32>
    %cst_102 = arith.constant dense<0.000000e+00> : vector<4xf32>
    %164 = vector.multi_reduction <add>, %163, %cst_102 [1] : vector<4x256xf32> to vector<4xf32>
    %165 = vector.shape_cast %164 : vector<4xf32> to vector<4x1xf32>
    %cst_103 = arith.constant 2.560000e+02 : f32
    %166 = vector.broadcast %cst_103 : f32 to vector<4x1xf32>
    %167 = arith.divf %165, %166 : vector<4x1xf32>
    %cst_104 = arith.constant 9.99999974E-6 : f32
    %168 = vector.broadcast %cst_104 : f32 to vector<4x1xf32>
    %169 = arith.addf %167, %168 : vector<4x1xf32>
    %170 = math.rsqrt %169 : vector<4x1xf32>
    %171 = vector.broadcast %170 : vector<4x1xf32> to vector<4x256xf32>
    %172 = arith.mulf %162, %171 : vector<4x256xf32>
    %c7 = arith.constant 7 : index
    %c0_105 = arith.constant 0 : index
    %c0_106 = arith.constant 0 : index
    %173 = vector.load %arg7[%c7, %c0_105, %c0_106] : memref<12x4x1xf32, #tpu.memory_space<vmem>>, vector<1x4x1xf32>
    %174 = vector.shape_cast %173 : vector<1x4x1xf32> to vector<4x1xf32>
    %175 = vector.broadcast %174 : vector<4x1xf32> to vector<4x256xf32>
    %176 = arith.mulf %172, %175 : vector<4x256xf32>
    %c8_107 = arith.constant 8 : index
    %c0_108 = arith.constant 0 : index
    %c0_109 = arith.constant 0 : index
    %177 = vector.load %arg7[%c8_107, %c0_108, %c0_109] : memref<12x4x1xf32, #tpu.memory_space<vmem>>, vector<1x4x1xf32>
    %178 = vector.shape_cast %177 : vector<1x4x1xf32> to vector<4x1xf32>
    %179 = vector.broadcast %178 : vector<4x1xf32> to vector<4x256xf32>
    %180 = arith.addf %176, %179 : vector<4x256xf32>
    %c241_i32_110 = arith.constant 241 : i32
    %181 = tpu.dynamic_rotate %180 by %c241_i32_110 dim 1 : vector<4x256xf32>, i32 -> vector<4x256xf32>
    %c1_i32_111 = arith.constant 1 : i32
    %182 = tpu.dynamic_rotate %180 by %c1_i32_111 dim 1 : vector<4x256xf32>, i32 -> vector<4x256xf32>
    %183 = vector.shape_cast %2 : vector<1x256xi1> to vector<1x256xi1>
    %184 = vector.broadcast %183 : vector<1x256xi1> to vector<4x256xi1>
    %185 = arith.select %184, %181, %182 : vector<4x256xi1>, vector<4x256xf32>
    %c15_i32_112 = arith.constant 15 : i32
    %186 = tpu.dynamic_rotate %180 by %c15_i32_112 dim 1 : vector<4x256xf32>, i32 -> vector<4x256xf32>
    %c255_i32_113 = arith.constant 255 : i32
    %187 = tpu.dynamic_rotate %180 by %c255_i32_113 dim 1 : vector<4x256xf32>, i32 -> vector<4x256xf32>
    %188 = vector.shape_cast %4 : vector<1x256xi1> to vector<1x256xi1>
    %189 = vector.broadcast %188 : vector<1x256xi1> to vector<4x256xi1>
    %190 = arith.select %189, %186, %187 : vector<4x256xi1>, vector<4x256xf32>
    %c16_i32_114 = arith.constant 16 : i32
    %191 = tpu.dynamic_rotate %185 by %c16_i32_114 dim 1 : vector<4x256xf32>, i32 -> vector<4x256xf32>
    %c108 = arith.constant 108 : index
    %c0_115 = arith.constant 0 : index
    %192 = vector.load %arg9[%c108, %c0_115] : memref<144x256xf32, #tpu.memory_space<vmem>>, vector<4x256xf32>
    tpu.vector_store %arg9[%c108, %c0_115], %191 {strides = array<i32>} : memref<144x256xf32, #tpu.memory_space<vmem>>, vector<4x256xf32>,
    %c16_i32_116 = arith.constant 16 : i32
    %193 = tpu.dynamic_rotate %180 by %c16_i32_116 dim 1 : vector<4x256xf32>, i32 -> vector<4x256xf32>
    %c112 = arith.constant 112 : index
    %c0_117 = arith.constant 0 : index
    %194 = vector.load %arg9[%c112, %c0_117] : memref<144x256xf32, #tpu.memory_space<vmem>>, vector<4x256xf32>
    tpu.vector_store %arg9[%c112, %c0_117], %193 {strides = array<i32>} : memref<144x256xf32, #tpu.memory_space<vmem>>, vector<4x256xf32>,
    %c16_i32_118 = arith.constant 16 : i32
    %195 = tpu.dynamic_rotate %190 by %c16_i32_118 dim 1 : vector<4x256xf32>, i32 -> vector<4x256xf32>
    %c116 = arith.constant 116 : index
    %c0_119 = arith.constant 0 : index
    %196 = vector.load %arg9[%c116, %c0_119] : memref<144x256xf32, #tpu.memory_space<vmem>>, vector<4x256xf32>
    tpu.vector_store %arg9[%c116, %c0_119], %195 {strides = array<i32>} : memref<144x256xf32, #tpu.memory_space<vmem>>, vector<4x256xf32>,
    %c120 = arith.constant 120 : index
    %c0_120 = arith.constant 0 : index
    %197 = vector.load %arg9[%c120, %c0_120] : memref<144x256xf32, #tpu.memory_space<vmem>>, vector<4x256xf32>
    tpu.vector_store %arg9[%c120, %c0_120], %185 {strides = array<i32>} : memref<144x256xf32, #tpu.memory_space<vmem>>, vector<4x256xf32>,
    %c124 = arith.constant 124 : index
    %c0_121 = arith.constant 0 : index
    %198 = vector.load %arg9[%c124, %c0_121] : memref<144x256xf32, #tpu.memory_space<vmem>>, vector<4x256xf32>
    tpu.vector_store %arg9[%c124, %c0_121], %180 {strides = array<i32>} : memref<144x256xf32, #tpu.memory_space<vmem>>, vector<4x256xf32>,
    %c128 = arith.constant 128 : index
    %c0_122 = arith.constant 0 : index
    %199 = vector.load %arg9[%c128, %c0_122] : memref<144x256xf32, #tpu.memory_space<vmem>>, vector<4x256xf32>
    tpu.vector_store %arg9[%c128, %c0_122], %190 {strides = array<i32>} : memref<144x256xf32, #tpu.memory_space<vmem>>, vector<4x256xf32>,
    %c240_i32_123 = arith.constant 240 : i32
    %200 = tpu.dynamic_rotate %185 by %c240_i32_123 dim 1 : vector<4x256xf32>, i32 -> vector<4x256xf32>
    %c132 = arith.constant 132 : index
    %c0_124 = arith.constant 0 : index
    %201 = vector.load %arg9[%c132, %c0_124] : memref<144x256xf32, #tpu.memory_space<vmem>>, vector<4x256xf32>
    tpu.vector_store %arg9[%c132, %c0_124], %200 {strides = array<i32>} : memref<144x256xf32, #tpu.memory_space<vmem>>, vector<4x256xf32>,
    %c240_i32_125 = arith.constant 240 : i32
    %202 = tpu.dynamic_rotate %180 by %c240_i32_125 dim 1 : vector<4x256xf32>, i32 -> vector<4x256xf32>
    %c136 = arith.constant 136 : index
    %c0_126 = arith.constant 0 : index
    %203 = vector.load %arg9[%c136, %c0_126] : memref<144x256xf32, #tpu.memory_space<vmem>>, vector<4x256xf32>
    tpu.vector_store %arg9[%c136, %c0_126], %202 {strides = array<i32>} : memref<144x256xf32, #tpu.memory_space<vmem>>, vector<4x256xf32>,
    %c240_i32_127 = arith.constant 240 : i32
    %204 = tpu.dynamic_rotate %190 by %c240_i32_127 dim 1 : vector<4x256xf32>, i32 -> vector<4x256xf32>
    %c140 = arith.constant 140 : index
    %c0_128 = arith.constant 0 : index
    %205 = vector.load %arg9[%c140, %c0_128] : memref<144x256xf32, #tpu.memory_space<vmem>>, vector<4x256xf32>
    tpu.vector_store %arg9[%c140, %c0_128], %204 {strides = array<i32>} : memref<144x256xf32, #tpu.memory_space<vmem>>, vector<4x256xf32>,
    %c0_129 = arith.constant 0 : index
    %c0_130 = arith.constant 0 : index
    %206 = vector.load %arg6[%c0_129, %c0_130] : memref<4x144xf32, #tpu.memory_space<vmem>>, vector<4x144xf32>
    %c0_131 = arith.constant 0 : index
    %c0_132 = arith.constant 0 : index
    %207 = vector.load %arg9[%c0_131, %c0_132] : memref<144x256xf32, #tpu.memory_space<vmem>>, vector<144x256xf32>
    %cst_133 = arith.constant dense<0.000000e+00> : vector<4x256xf32>
    %208 = tpu.matmul %206, %207, %cst_133 {dimension_numbers = #tpu.dot_dimension_numbers<[1], [0], [0], [1], [0, 0, 1, 1], [], []>} : vector<4x144xf32>, vector<144x256xf32>, vector<4x256xf32> -> vector<4x256xf32>
    %c9 = arith.constant 9 : index
    %c0_134 = arith.constant 0 : index
    %c0_135 = arith.constant 0 : index
    %209 = vector.load %arg7[%c9, %c0_134, %c0_135] : memref<12x4x1xf32, #tpu.memory_space<vmem>>, vector<1x4x1xf32>
    %210 = vector.shape_cast %209 : vector<1x4x1xf32> to vector<4x1xf32>
    %211 = vector.broadcast %210 : vector<4x1xf32> to vector<4x256xf32>
    %212 = arith.addf %208, %211 : vector<4x256xf32>
    %c0_136 = arith.constant 0 : index
    %c0_137 = arith.constant 0 : index
    %c0_138 = arith.constant 0 : index
    %213 = vector.load %arg8[%c0_136, %c0_137, %c0_138] : memref<1x4x256xf32, #tpu.memory_space<vmem>>, vector<1x4x256xf32>
    %214 = vector.shape_cast %213 : vector<1x4x256xf32> to vector<4x256xf32>
    %215 = vector.shape_cast %212 : vector<4x256xf32> to vector<1x4x256xf32>
    tpu.vector_store %arg8[%c0_136, %c0_137, %c0_138], %215 {strides = array<i32>} : memref<1x4x256xf32, #tpu.memory_space<vmem>>, vector<1x4x256xf32>,
    return
  }
  func.func @transform_0(%arg0: i32) -> (i32, i32, i32) {
    %c0_i32 = arith.constant 0 : i32
    %c0_i32_0 = arith.constant 0 : i32
    %c0_i32_1 = arith.constant 0 : i32
    return %arg0, %c0_i32, %c0_i32_0 : i32, i32, i32
  }
  func.func @transform_1(%arg0: i32) -> (i32, i32) {
    %c0_i32 = arith.constant 0 : i32
    %c0_i32_0 = arith.constant 0 : i32
    %c0_i32_1 = arith.constant 0 : i32
    return %c0_i32, %c0_i32_0 : i32, i32
  }
  func.func @transform_2(%arg0: i32) -> (i32, i32) {
    %c0_i32 = arith.constant 0 : i32
    %c0_i32_0 = arith.constant 0 : i32
    %c0_i32_1 = arith.constant 0 : i32
    return %c0_i32, %c0_i32_0 : i32, i32
  }
  func.func @transform_3(%arg0: i32) -> (i32, i32) {
    %c0_i32 = arith.constant 0 : i32
    %c0_i32_0 = arith.constant 0 : i32
    %c0_i32_1 = arith.constant 0 : i32
    return %c0_i32, %c0_i32_0 : i32, i32
  }
  func.func @transform_4(%arg0: i32) -> (i32, i32) {
    %c0_i32 = arith.constant 0 : i32
    %c0_i32_0 = arith.constant 0 : i32
    %c0_i32_1 = arith.constant 0 : i32
    return %c0_i32, %c0_i32_0 : i32, i32
  }
  func.func @transform_5(%arg0: i32) -> (i32, i32) {
    %c0_i32 = arith.constant 0 : i32
    %c0_i32_0 = arith.constant 0 : i32
    %c0_i32_1 = arith.constant 0 : i32
    return %c0_i32, %c0_i32_0 : i32, i32
  }
  func.func @transform_6(%arg0: i32) -> (i32, i32, i32) {
    %c0_i32 = arith.constant 0 : i32
    %c0_i32_0 = arith.constant 0 : i32
    %c0_i32_1 = arith.constant 0 : i32
    %c0_i32_2 = arith.constant 0 : i32
    return %c0_i32, %c0_i32_0, %c0_i32_1 : i32, i32, i32
  }
  func.func @transform_7(%arg0: i32) -> (i32, i32, i32) {
    %c0_i32 = arith.constant 0 : i32
    %c0_i32_0 = arith.constant 0 : i32
    %c0_i32_1 = arith.constant 0 : i32
    return %arg0, %c0_i32, %c0_i32_0 : i32, i32, i32
  }
}

</mosaic_0001>

<bundles_post_ra>
// kernel: conv_block_ine_dense.1
= control target key start
LH: loop header
LB: loop body
LE: loop exit
PB: predicated region body
PF: predicated region fallthrough
CT: control target
= control target key end

     0   :  { %s1461_s24 = smov 0   ;;  %s1973_s0 = inlined_call_operand.vmem [shape: f32[2,4,256], index: 0, kind: input, shape index: {}]   ;;  %s1974_s1 = inlined_call_operand.vmem [shape: s32[1,256], index: 1, kind: input, shape index: {}]   ;;  %s1975_s2 = inlined_call_operand.vmem [shape: f32[4,36], index: 2, kind: input, shape index: {}]   ;;  %s1976_s3 = inlined_call_operand.vmem [shape: f32[4,72], index: 3, kind: input, shape index: {}]   ;;  %s1977_s4 = inlined_call_operand.vmem [shape: f32[4,108], index: 4, kind: input, shape index: {}]   ;;  %s1978_s5 = inlined_call_operand.vmem [shape: f32[4,144], index: 5, kind: input, shape index: {}]   ;;  %s1979_s6 = inlined_call_operand.vmem [shape: f32[12,4,1], index: 6, kind: input, shape index: {}]   ;;  %s1980_s7 = inlined_call_operand.vmem [shape: f32[2,4,256], index: 7, kind: output, shape index: {}]  }
   0x1 LB: > { %s1344_s25 = sadd.s32 4294967295, %s1411_s24   ;;  %p1348_p0 = scmp.ge.s32.totalorder %s1411_s24, 1  ;;  %s1411_s24 = sphi %s1461_s24, %s17_s24  }
   0x2   : > { %p237_p1 = scmp.lt.s32.totalorder %s1411_s24, 3 }
   0x4   : > { %p238_p2 = pnand %p1348_p0, %p237_p1 }
   0x5   : > { %p269_p3 = scmp.lt.s32.totalorder (!%p238_p2), %s1344_s25, 1  ;;  %s1413_s30 = smov (!%p238_p2), 113  }
   0x6   : > { %241 = sbr.rel (%p238_p2) target bundleno = 2591 (0xa1f), region = 48  ;;  %s1414_s8 = smov (!%p238_p2), 15  }
   0x7   : > { %s1415_s9 = smov (!%p238_p2), 127   ;;  %s1416_s10 = smov (!%p238_p2), 1  }
   0x8   : > { %s1417_s11 = smov (!%p238_p2), 16   ;;  %s1418_s12 = smov (!%p238_p2), 112  }
   0xb   : > { %s1990_s25 = smov (!%p269_p3, %s1344_s25), 1  ;;  %v1419_v14 = vmov 0   ;;  %v279_v16 = vld [vmem:[%s1974_s1] sm:$0x3]  ;;  %v293_v18 = vlaneseq  ;;  %vm464_vm12 = vcmask 1043456   ;;  %vm460_vm13 = vcmask 293888  }
   0xc   : > { %s1376_s26 = sshll.u32 %s1990_s25, 3  ;;  %1394 = vset.pattern.permute.xlu2 %v1419_v14  ;;  %1395 = vset.pattern.permute.xlu0 %v1419_v14  ;;  %vm281_vm0 = vcmp.eq.s32.totalorder %v279_v16, 15  ;;  %vm280_vm1 = vcmp.eq.s32.totalorder %v279_v16, 0 }
   0xd   : > { %s273_s29 = scalar_lea.vmem %s1973_s0, %s1376_s26  ;;  %1396 = vset.pattern.permute.xlu1 %v1419_v14  ;;  %v341_v20 = vsel %vm281_vm0, 1, %v1419_v14  ;;  %v1492_v21 = vand.u32 127, %v293_v18  ;;  %v310_v29 = vsel %vm280_vm1, 1, %v1419_v14  ;;  %s278_s28 = scalar_lea.vmem %s1980_s7, %s1376_s26 }
   0xe   : > { %v282_v0 = vld [vmem:[%s273_s29] sm:$0xff]  ;;  %v343_v22 = vperm.slane %v341_v20, 1  ;;  %v342_v23 = vperm.slane %v341_v20, 0  ;;  %v312_v37 = vperm.slane %v310_v29, 1  ;;  %v311_v38 = vperm.slane %v310_v29, 0 }
   0xf   : > { %284 = vst [vmem:[#allocation1] ss:$2 sm:$0xff] %v282_v0  ;;  %vm326_vm2 = vcmp.lt.s32.totalorder %v1492_v21, 15  ;;  %vm338_vm3 = vcmp.lt.s32.totalorder %v1492_v21, 127  ;;  %vm295_vm6 = vcmp.lt.s32.totalorder %v1492_v21, 113  ;;  %vm307_vm7 = vcmp.lt.s32.totalorder %v1492_v21, 1 }
  0x10   : > { %vm1496_vm4 = vcmp.eq.s32.totalorder %v343_v22, 1  ;;  %vm1500_vm5 = vcmp.eq.s32.totalorder %v342_v23, 1  ;;  %vm1519_vm8 = vcmp.eq.s32.totalorder %v312_v37, 1  ;;  %vm1523_vm9 = vcmp.eq.s32.totalorder %v311_v38, 1 }
  0x11   : > { %vm352_vm10 = vcmp.lt.s32.totalorder %v1492_v21, 16  ;;  %vm411_vm11 = vcmp.lt.s32.totalorder %v1492_v21, 112 }
  0x16   : > { %v285_v1 = vld.sshfl [vmem:[#allocation1] sm:$0xff pattern:$0x75316420]  ;;  %v286_v2 = vld.sshfl [vmem:[#allocation1 + $0x8] sm:$0xff pattern:$0x75316420] }
  0x17   : > { %298 = vst [vmem:[#allocation1] ss:$2 sm:$0xff] %v282_v0  ;;  %289 = vrot.lane.b32.xlu2 %v285_v1, %s1413_s30 }
  0x1e   : > { %v299_v3 = vld.sshfl [vmem:[#allocation1] sm:$0xff pattern:$0x75316420]  ;;  %v300_v4 = vld.sshfl [vmem:[#allocation1 + $0x8] sm:$0xff pattern:$0x75316420] }
  0x1f   : > { %317 = vst [vmem:[#allocation1] ss:$2 sm:$0xff] %v282_v0  ;;  %291 = vrot.lane.b32.xlu2 %v286_v2, %s1413_s30 }
  0x26   : > { %v318_v5 = vld.sshfl [vmem:[#allocation1] sm:$0xff pattern:$0x75316420]  ;;  %v319_v6 = vld.sshfl [vmem:[#allocation1 + $0x8] sm:$0xff pattern:$0x75316420] }
  0x27   : > { %322 = vrot.lane.b32.xlu0 %v318_v5, %s1414_s8  ;;  %329 = vst [vmem:[#allocation1] ss:$2 sm:$0xff] %v282_v0  ;;  %v454_v5 = vld [vmem:[%s1979_s6] sm:$0xf] }
  0x2e   : > { %v330_v7 = vld.sshfl [vmem:[#allocation1] sm:$0xff pattern:$0x75316420]  ;;  %v331_v8 = vld.sshfl [vmem:[#allocation1 + $0x8] sm:$0xff pattern:$0x75316420] }
  0x2f   : > { %324 = vrot.lane.b32.xlu0 %v319_v6, %s1414_s8  ;;  %334 = vrot.lane.b32.xlu1 %v330_v7, %s1415_s9  ;;  %357 = vst [vmem:[#allocation1] ss:$2 sm:$0xff] %v282_v0 }
  0x36   : > { %v358_v9 = vld.sshfl [vmem:[#allocation1] sm:$0xff pattern:$0x75316420]  ;;  %v359_v10 = vld.sshfl [vmem:[#allocation1 + $0x8] sm:$0xff pattern:$0x75316420] }
  0x37   : > { %336 = vrot.lane.b32.xlu1 %v331_v8, %s1415_s9  ;;  %303 = vrot.lane.b32.xlu0 %v299_v3, %s1416_s10  ;;  %392 = vst [vmem:[#allocation1] ss:$2 sm:$0xff] %v282_v0 }
  0x38   : > { %362 = vrot.lane.b32.xlu2 %v358_v9, %s1417_s11 }
  0x3e   : > { %v393_v11 = vld.sshfl [vmem:[#allocation1] sm:$0xff pattern:$0x75316420]  ;;  %v394_v12 = vld.sshfl [vmem:[#allocation1 + $0x8] sm:$0xff pattern:$0x75316420] }
  0x3f   : > { %305 = vrot.lane.b32.xlu1 %v300_v4, %s1416_s10  ;;  %364 = vrot.lane.b32.xlu0 %v359_v10, %s1417_s11  ;;  %397 = vst [vmem:[#allocation2 + $0x108] sm:$0xf] %v393_v11  ;;  %v1357_v10 = vld [vmem:[%s1979_s6 + $0x4] sm:$0xf] }
  0x40   : > { %398 = vst [vmem:[#allocation2 + $0x68] sm:$0xf] %v394_v12 }
  0x41   : > { %416 = vst [vmem:[#allocation1] ss:$2 sm:$0xff] %v282_v0 }
  0x48   : > { %v417_v13 = vld.sshfl [vmem:[#allocation1] sm:$0xff pattern:$0x75316420]  ;;  %v418_v15 = vld.sshfl [vmem:[#allocation1 + $0x8] sm:$0xff pattern:$0x75316420] }
  0x49   : > { %421 = vrot.lane.b32.xlu2 %v417_v13, %s1418_s12  ;;  %423 = vrot.lane.b32.xlu0 %v418_v15, %s1418_s12 }
  0x71   : > { %v290_v24 = vpop.permute.xlu2 %289 }
  0x79   : > { %v292_v40 = vpop.permute.xlu2 %291 }
  0x7a   : > { %v296_v45 = vsel %vm295_vm6, %v290_v24, %v292_v40  ;;  %v297_v46 = vsel %vm295_vm6, %v292_v40, %v290_v24 }
  0x92   : > { %v363_v53 = vpop.permute.xlu2 %362 }
  0x99   : > { %v323_v17 = vpop.permute.xlu0 %322 }
  0xa1   : > { %v335_v19 = vpop.permute.xlu1 %334  ;;  %v325_v25 = vpop.permute.xlu0 %324 }
  0xa2   : > { %v327_v30 = vsel %vm326_vm2, %v323_v17, %v325_v25  ;;  %v328_v31 = vsel %vm326_vm2, %v325_v25, %v323_v17  ;;  %v1358_v17 = vld [vmem:[%s1979_s6 + $0x8] sm:$0xf] }
  0xa3   : > { %v422_v59 = vpop.permute.xlu2 %421 }
  0xa9   : > { %v337_v28 = vpop.permute.xlu1 %336  ;;  %v304_v41 = vpop.permute.xlu0 %303 }
  0xaa   : > { %v339_v32 = vsel %vm338_vm3, %v335_v19, %v337_v28  ;;  %v340_v33 = vsel %vm338_vm3, %v337_v28, %v335_v19 }
  0xab   : > { %v347_v34 = vsel %vm1496_vm4, %v327_v30, %v340_v33  ;;  %v346_v35 = vsel %vm1500_vm5, %v328_v31, %v339_v32  ;;  %v443_v31 = vld [vmem:[%s1975_s2] sm:$0xf] }
  0xac   : > { %v402_v36 = vrot.slane %v347_v34, 4  ;;  %437 = vrot.lane.b32.xlu2 %v347_v34, %s1418_s12  ;;  %v401_v39 = vrot.slane %v346_v35, 4 }
  0xae   : > { %406 = vst [vmem:[#allocation2 + $0x68] sm:$0xf0] %v402_v36 }
  0xaf   : > { %405 = vst [vmem:[#allocation2 + $0x108] sm:$0xf0] %v401_v39 }
  0xb1   : > { %v306_v44 = vpop.permute.xlu1 %305  ;;  %v365_v54 = vpop.permute.xlu0 %364 }
  0xb2   : > { %v308_v47 = vsel %vm307_vm7, %v304_v41, %v306_v44  ;;  %v309_v48 = vsel %vm307_vm7, %v306_v44, %v304_v41  ;;  %v366_v55 = vsel %vm352_vm10, %v363_v53, %v365_v54  ;;  %v367_v56 = vsel %vm352_vm10, %v365_v54, %v363_v53 }
  0xb3   : > { %v316_v49 = vsel %vm1519_vm8, %v297_v46, %v308_v47  ;;  %v315_v50 = vsel %vm1523_vm9, %v296_v45, %v309_v48  ;;  %v370_v57 = vrot.slane %v367_v56, 4  ;;  %v371_v58 = vrot.slane %v366_v55, 4 }
  0xb4   : > { %409 = vrot.lane.b32.xlu1 %v316_v49, %s1418_s12  ;;  %v387_v51 = vrot.slane %v316_v49, 4  ;;  %v386_v52 = vrot.slane %v315_v50, 4  ;;  %407 = vrot.lane.b32.xlu0 %v315_v50, %s1418_s12  ;;  %v1420_v46 = vmov 256.0  }
  0xb5   : > { %378 = vrot.lane.b32.xlu2 %v347_v34, %s1417_s11  ;;  %374 = vst [vmem:[#allocation2 + $0xb0] sm:$0xf0] %v370_v57  ;;  %v1588_v22 = vld [vmem:[#allocation2 + $0x68] sm:$0xff]  ;;  %1397 = vrcp.f32 %v1420_v46 }
  0xb6   : > { %391 = vst [vmem:[#allocation2 + $0x48] sm:$0xf0] %v387_v51  ;;  %v1585_v20 = vld [vmem:[#allocation2 + $0x108] sm:$0xff] }
  0xb7   : > { %390 = vst [vmem:[#allocation2 + $0x10] sm:$0xf0] %v386_v52 }
  0xb8   : > { %375 = vst [vmem:[#allocation2 + $0xd0] sm:$0xf0] %v371_v58 }
  0xbb   : > { %v424_v60 = vpop.permute.xlu0 %423  ;;  %v1398_v47 = vpop.eup %1397 }
  0xbc   : > { %435 = vrot.lane.b32.xlu1 %v346_v35, %s1418_s12  ;;  %348 = vrot.lane.b32.xlu0 %v315_v50, %s1417_s11  ;;  %v425_v61 = vsel %vm411_vm11, %v422_v59, %v424_v60  ;;  %v426_v62 = vsel %vm411_vm11, %v424_v60, %v422_v59  ;;  %v519_v48 = vmul.f32 256.0, %v1398_v47  ;;  %vm523_vm14 = vweird.f32 %v1398_v47 }
  0xbd   : > { %v429_v63 = vrot.slane %v425_v61, 4  ;;  %v430_v0 = vrot.slane %v426_v62, 4  ;;  %457 = vperm.xlu2 %1394, %v454_v5  }
  0xbf   : > { %433 = vst [vmem:[#allocation2 + $0x30] sm:$0xf0] %v429_v63 }
  0xc0   : > { %434 = vst [vmem:[#allocation2 + $0x18] sm:$0xf0] %v430_v0 }
  0xc4   : > { %376 = vrot.lane.b32.xlu1 %v346_v35, %s1417_s11 }
  0xc5   : > { %553 = vperm.xlu2 %1394, %v1357_v10  }
  0xcc   : > { %350 = vrot.lane.b32.xlu1 %v316_v49, %s1417_s11  ;;  %v520_v49 = vsub.f32 1.0, %v519_v48 }
  0xcd   : > { %562 = vperm.xlu2 %1394, %v1358_v17  }
  0xce   : > { %v521_v50 = vmul.f32 %v1398_v47, %v520_v49 }
  0xd0   : > { %v522_v51 = vadd.f32 %v1398_v47, %v521_v50 }
  0xd2   : > { %v1612_v52 = vsel %vm523_vm14, %v1398_v47, %v522_v51 }
 0x106   : > { %v438_v6 = vpop.permute.xlu2 %437 }
 0x10f   : > { %v379_v11 = vpop.permute.xlu2 %378 }
 0x117   : > { %v458_v34 = vpop.permute.xlu2 %457 }
 0x126   : > { %v410_v1 = vpop.permute.xlu1 %409  ;;  %v408_v2 = vpop.permute.xlu0 %407 }
 0x127   : > { %v412_v3 = vsel %vm411_vm11, %v408_v2, %v410_v1  ;;  %v413_v4 = vsel %vm411_vm11, %v410_v1, %v408_v2 }
 0x128   : > { %414 = vst [vmem:[#allocation2 + $0x30] sm:$0xf] %v412_v3 }
 0x129   : > { %415 = vst [vmem:[#allocation2 + $0x18] sm:$0xf] %v413_v4  ;;  %v554_v4 = vpop.permute.xlu2 %553 }
 0x12e   : > { %v436_v7 = vpop.permute.xlu1 %435  ;;  %v349_v23 = vpop.permute.xlu0 %348 }
 0x12f   : > { %v439_v8 = vsel %vm411_vm11, %v436_v7, %v438_v6  ;;  %v440_v9 = vsel %vm411_vm11, %v438_v6, %v436_v7  ;;  %v1579_v18 = vld [vmem:[#allocation2 + $0x30] sm:$0xff] }
 0x130   : > { %441 = vst [vmem:[#allocation2 + $0x80] sm:$0xf] %v439_v8  ;;  %v1582_v19 = vld [vmem:[#allocation2 + $0x18] sm:$0xff] }
 0x131   : > { %442 = vst [vmem:[#allocation2 + $0x110] sm:$0xf] %v440_v9 }
 0x136   : > { %v377_v12 = vpop.permute.xlu1 %376 }
 0x137   : > { %v380_v13 = vsel %vm352_vm10, %v377_v12, %v379_v11  ;;  %v381_v14 = vsel %vm352_vm10, %v379_v11, %v377_v12  ;;  %v452_v15 = vld [vmem:[#allocation2 + $0x80] sm:$0xf] }
 0x138   : > { %382 = vst [vmem:[#allocation2 + $0x10] sm:$0xf] %v381_v14  ;;  %1353 = vmatpush.msk.msra.mxu0 %vm464_vm12, %v452_v15  ;;  %v453_v16 = vld [vmem:[#allocation2 + $0x110] sm:$0xf] }
 0x139   : > { %383 = vst [vmem:[#allocation2 + $0x48] sm:$0xf] %v380_v13  ;;  %1355 = vmatpush.msk.msra.mxu1 %vm464_vm12, %v453_v16  ;;  %v563_v13 = vpop.permute.xlu2 %562 }
 0x13a   : > { %483 = vmatpush.msra.mxu0 %v1579_v18 }
 0x13b   : > { %503 = vmatpush.msra.mxu1 %v1582_v19 }
 0x13c   : > { %484 = vmatpush.msra.mxu0 %v1585_v20 }
 0x13d   : > { %504 = vmatpush.msra.mxu1 %v1588_v22 }
 0x13e   : > { %v351_v24 = vpop.permute.xlu1 %350 }
 0x13f   : > { %v353_v25 = vsel %vm352_vm10, %v349_v23, %v351_v24  ;;  %v354_v28 = vsel %vm352_vm10, %v351_v24, %v349_v23  ;;  %v1595_v29 = vld [vmem:[#allocation2 + $0x10] sm:$0xff] }
 0x140   : > { %355 = vst [vmem:[#allocation2 + $0xb0] sm:$0xf] %v354_v28  ;;  %485 = vmatpush.msra.mxu0 %v1595_v29  ;;  %v1598_v30 = vld [vmem:[#allocation2 + $0x48] sm:$0xff] }
 0x141   : > { %356 = vst [vmem:[#allocation2 + $0xd0] sm:$0xf] %v353_v25  ;;  %505 = vmatpush.msra.mxu1 %v1598_v30 }
 0x147   : > { %v1604_v32 = vld [vmem:[#allocation2 + $0xb0] sm:$0xff] }
 0x148   : > { %486 = vmatpush.msra.mxu0 %v1604_v32  ;;  %v1607_v33 = vld [vmem:[#allocation2 + $0xd0] sm:$0xff] }
 0x149   : > { %506 = vmatpush.msra.mxu1 %v1607_v33  ;;  %1354 = vmatmul.msk.f32.vlgmr.msra.gmra.mxu0 %vm460_vm13, %v443_v31 }
 0x14a   : > { %1356 = vmatmul.msk.f32.vlgmr.msra.gmra.mxu1 %vm460_vm13, %v443_v31  ;;  %vm705_vm13 = vcmask 588800  }
 0x1c6   : > { %v488_v35 = vpop.f32.mrf.mxu0 }
 0x1c7   : > { %v508_v36 = vpop.f32.mrf.mxu1  ;;  %v489_v37 = vadd.f32 %v488_v35, %v458_v34 }
 0x1c8   : > { %v509_v38 = vadd.f32 %v508_v36, %v458_v34 }
 0x1c9   : > { %v511_v39 = vmax.f32 %v489_v37, 0.0 }
 0x1ca   : > { %v512_v40 = vmax.f32 %v509_v38, 0.0 }
 0x1cb   : > { %v513_v41 = vsel %vm464_vm12, %v511_v39, 0.0 }
 0x1cc   : > { %v514_v44 = vsel %vm464_vm12, %v512_v40, 0.0 }
 0x1cd   : > { %v515_v45 = vadd.f32 %v514_v44, %v513_v41 }
 0x1cf   : > { %516 = vadd.xlane.f32.xlu0 %v515_v45 }
 0x242   : > { %v517_v53 = vpop.xlane.xlu0 %516 }
 0x243   : > { %v525_v54 = vmul.f32 %v1612_v52, %v517_v53 }
 0x245   : > { %v526_v55 = vsub.f32 %v511_v39, %v525_v54  ;;  %v527_v56 = vsub.f32 %v512_v40, %v525_v54 }
 0x247   : > { %v528_v57 = vmul.f32 %v526_v55, %v526_v55  ;;  %v529_v58 = vmul.f32 %v527_v56, %v527_v56 }
 0x249   : > { %v530_v59 = vsel %vm464_vm12, %v528_v57, 0.0  ;;  %v531_v60 = vsel %vm464_vm12, %v529_v58, 0.0 }
 0x24a   : > { %v532_v61 = vadd.f32 %v531_v60, %v530_v59 }
 0x24c   : > { %533 = vadd.xlane.f32.xlu1 %v532_v61 }
 0x2bf   : > { %v534_v62 = vpop.xlane.xlu1 %533 }
 0x2c0   : > { %v535_v63 = vmul.f32 %v534_v62, %v1612_v52 }
 0x2c2   : > { %v536_v0 = vadd.f32 1e-05, %v535_v63 }
 0x2c4   : > { %1399 = vrsqrt.f32 %v536_v0  ;;  %vm543_vm0 = vweird.f32 %v536_v0 }
 0x2ca   : > { %v1400_v1 = vpop.eup %1399 }
 0x2cb   : > { %v538_v2 = vmul.f32 %v1400_v1, %v536_v0  ;;  %vm544_vm15 = vweird.f32 %v1400_v1 }
 0x2cc   : > { %vm545_vm1 = vmor %vm543_vm0, %vm544_vm15 }
 0x2cd   : > { %v539_v3 = vmul.f32 %v1400_v1, %v538_v2 }
 0x2cf   : > { %v540_v5 = vmul.f32 0.5, %v539_v3 }
 0x2d1   : > { %v541_v6 = vsub.f32 1.5, %v540_v5 }
 0x2d3   : > { %v542_v7 = vmul.f32 %v1400_v1, %v541_v6 }
 0x2d5   : > { %v546_v8 = vsel %vm545_vm1, %v1400_v1, %v542_v7  ;;  %v1359_v7 = vld [vmem:[%s1979_s6 + $0xc] sm:$0xf]  ;;  %vm940_vm1 = vcmask 883712  }
 0x2d6   : > { %v547_v9 = vmul.f32 %v546_v8, %v526_v55  ;;  %v548_v10 = vmul.f32 %v546_v8, %v527_v56 }
 0x2d8   : > { %v556_v11 = vmul.f32 %v554_v4, %v547_v9  ;;  %v557_v12 = vmul.f32 %v554_v4, %v548_v10 }
 0x2da   : > { %v565_v14 = vadd.f32 %v563_v13, %v556_v11  ;;  %v566_v15 = vadd.f32 %v563_v13, %v557_v12 }
 0x2dc   : > { %569 = vrot.lane.b32.xlu1 %v566_v15, %s1413_s30  ;;  %567 = vrot.lane.b32.xlu0 %v565_v14, %s1413_s30  ;;  %v635_v16 = vrot.slane %v565_v14, 4  ;;  %v636_v17 = vrot.slane %v566_v15, 4 }
 0x2dd   : > { %581 = vrot.lane.b32.xlu2 %v565_v14, %s1414_s8 }
 0x2de   : > { %639 = vst [vmem:[#allocation2 + $0xf8] sm:$0xf0] %v635_v16  ;;  %v1362_v16 = vld [vmem:[%s1979_s6 + $0x10] sm:$0xf] }
 0x2df   : > { %640 = vst [vmem:[#allocation2 + $0x38] sm:$0xf0] %v636_v17 }
 0x2e4   : > { %659 = vrot.lane.b32.xlu1 %v566_v15, %s1418_s12 }
 0x2e5   : > { %583 = vrot.lane.b32.xlu2 %v566_v15, %s1414_s8 }
 0x2ed   : > { %587 = vrot.lane.b32.xlu2 %v565_v14, %s1415_s9 }
 0x2f5   : > { %589 = vrot.lane.b32.xlu2 %v566_v15, %s1415_s9 }
 0x2fd   : > { %573 = vrot.lane.b32.xlu2 %v565_v14, %s1416_s10 }
 0x305   : > { %575 = vrot.lane.b32.xlu2 %v566_v15, %s1416_s10 }
 0x30d   : > { %657 = vrot.lane.b32.xlu2 %v565_v14, %s1418_s12 }
 0x337   : > { %v582_v23 = vpop.permute.xlu2 %581 }
 0x33f   : > { %v584_v24 = vpop.permute.xlu2 %583 }
 0x340   : > { %v585_v31 = vsel %vm326_vm2, %v582_v23, %v584_v24  ;;  %v586_v34 = vsel %vm326_vm2, %v584_v24, %v582_v23 }
 0x347   : > { %v588_v25 = vpop.permute.xlu2 %587 }
 0x34e   : > { %v570_v40 = vpop.permute.xlu1 %569  ;;  %v568_v41 = vpop.permute.xlu0 %567 }
 0x34f   : > { %v590_v28 = vpop.permute.xlu2 %589  ;;  %v571_v45 = vsel %vm295_vm6, %v568_v41, %v570_v40  ;;  %v572_v46 = vsel %vm295_vm6, %v570_v40, %v568_v41 }
 0x350   : > { %v591_v35 = vsel %vm338_vm3, %v588_v25, %v590_v28  ;;  %v592_v36 = vsel %vm338_vm3, %v590_v28, %v588_v25 }
 0x351   : > { %v594_v37 = vsel %vm1496_vm4, %v585_v31, %v592_v36  ;;  %v593_v38 = vsel %vm1500_vm5, %v586_v34, %v591_v35 }
 0x352   : > { %667 = vrot.lane.b32.xlu2 %v594_v37, %s1418_s12  ;;  %642 = vst [vmem:[#allocation2 + $0x78] sm:$0xf] %v594_v37  ;;  %665 = vrot.lane.b32.xlu0 %v593_v38, %s1418_s12 }
 0x353   : > { %641 = vst [vmem:[#allocation2 + $0x8] sm:$0xf] %v593_v38 }
 0x356   : > { %v660_v51 = vpop.permute.xlu1 %659 }
 0x357   : > { %v574_v39 = vpop.permute.xlu2 %573 }
 0x35a   : > { %619 = vrot.lane.b32.xlu2 %v594_v37, %s1417_s11 }
 0x35f   : > { %v576_v44 = vpop.permute.xlu2 %575 }
 0x360   : > { %v577_v47 = vsel %vm307_vm7, %v574_v39, %v576_v44  ;;  %v578_v48 = vsel %vm307_vm7, %v576_v44, %v574_v39  ;;  %v1363_v39 = vld [vmem:[%s1979_s6 + $0x14] sm:$0xf] }
 0x361   : > { %v579_v49 = vsel %vm1523_vm9, %v571_v45, %v578_v48  ;;  %v580_v50 = vsel %vm1519_vm8, %v572_v46, %v577_v47  ;;  %v679_v46 = vld [vmem:[%s1976_s3] sm:$0xf] }
 0x362   : > { %609 = vrot.lane.b32.xlu2 %v565_v14, %s1417_s11  ;;  %643 = vrot.lane.b32.xlu1 %v579_v49, %s1418_s12  ;;  %631 = vst [vmem:[#allocation2 + $0xf8] sm:$0xf] %v579_v49 }
 0x363   : > { %645 = vrot.lane.b32.xlu0 %v580_v50, %s1418_s12  ;;  %632 = vst [vmem:[#allocation2 + $0x38] sm:$0xf] %v580_v50 }
 0x367   : > { %v658_v53 = vpop.permute.xlu2 %657 }
 0x368   : > { %v661_v54 = vsel %vm411_vm11, %v658_v53, %v660_v51  ;;  %v662_v55 = vsel %vm411_vm11, %v660_v51, %v658_v53 }
 0x369   : > { %663 = vst [vmem:[#allocation2 + $0x20] sm:$0xf] %v661_v54  ;;  %v1696_v17 = vld [vmem:[#allocation2 + $0xf8] sm:$0xff] }
 0x36a   : > { %664 = vst [vmem:[#allocation2 + $0xc8] sm:$0xf] %v662_v55  ;;  %595 = vrot.lane.b32.xlu1 %v579_v49, %s1417_s11  ;;  %v1699_v23 = vld [vmem:[#allocation2 + $0x38] sm:$0xff] }
 0x36b   : > { %617 = vrot.lane.b32.xlu0 %v593_v38, %s1417_s11 }
 0x372   : > { %611 = vrot.lane.b32.xlu1 %v566_v15, %s1417_s11 }
 0x373   : > { %597 = vrot.lane.b32.xlu0 %v580_v50, %s1417_s11 }
 0x37b   : > { %702 = vperm.xlu0 %1395, %v1359_v7  }
 0x383   : > { %784 = vperm.xlu0 %1395, %v1362_v16  }
 0x38b   : > { %793 = vperm.xlu0 %1395, %v1363_v39  }
 0x3ac   : > { %v668_v56 = vpop.permute.xlu2 %667 }
 0x3b4   : > { %v620_v6 = vpop.permute.xlu2 %619 }
 0x3bc   : > { %v610_v24 = vpop.permute.xlu2 %609 }
 0x3c4   : > { %v666_v57 = vpop.permute.xlu0 %665 }
 0x3c5   : > { %v669_v58 = vsel %vm411_vm11, %v666_v57, %v668_v56  ;;  %v670_v59 = vsel %vm411_vm11, %v668_v56, %v666_v57 }
 0x3c6   : > { %v673_v60 = vrot.slane %v669_v58, 4  ;;  %v674_v61 = vrot.slane %v670_v59, 4 }
 0x3c8   : > { %677 = vst [vmem:[#allocation2 + $0x20] sm:$0xf0] %v673_v60 }
 0x3c9   : > { %678 = vst [vmem:[#allocation2 + $0xc8] sm:$0xf0] %v674_v61 }
 0x3cf   : > { %v1670_v62 = vld [vmem:[#allocation2 + $0x20] sm:$0xff] }
 0x3d0   : > { %716 = vmatpush.msra.mxu2 %v1670_v62  ;;  %v1673_v63 = vld [vmem:[#allocation2 + $0xc8] sm:$0xff] }
 0x3d1   : > { %736 = vmatpush.msra.mxu3 %v1673_v63 }
 0x3d4   : > { %v644_v0 = vpop.permute.xlu1 %643 }
 0x3d5   : > { %v646_v1 = vpop.permute.xlu0 %645 }
 0x3d6   : > { %v647_v2 = vsel %vm411_vm11, %v644_v0, %v646_v1  ;;  %v648_v3 = vsel %vm411_vm11, %v646_v1, %v644_v0 }
 0x3d7   : > { %v651_v4 = vrot.slane %v647_v2, 4  ;;  %v652_v5 = vrot.slane %v648_v3, 4 }
 0x3d9   : > { %655 = vst [vmem:[#allocation2 + $0x8] sm:$0xf0] %v651_v4 }
 0x3da   : > { %656 = vst [vmem:[#allocation2 + $0x78] sm:$0xf0] %v652_v5 }
 0x3dc   : > { %v596_v8 = vpop.permute.xlu1 %595 }
 0x3dd   : > { %v618_v9 = vpop.permute.xlu0 %617 }
 0x3de   : > { %v621_v10 = vsel %vm352_vm10, %v618_v9, %v620_v6  ;;  %v622_v11 = vsel %vm352_vm10, %v620_v6, %v618_v9 }
 0x3df   : > { %v625_v12 = vrot.slane %v622_v11, 4  ;;  %v626_v13 = vrot.slane %v621_v10, 4 }
 0x3e0   : > { %v1687_v14 = vld [vmem:[#allocation2 + $0x8] sm:$0xff] }
 0x3e1   : > { %629 = vst [vmem:[#allocation2 + $0x118] sm:$0xf0] %v625_v12  ;;  %717 = vmatpush.msra.mxu2 %v1687_v14  ;;  %v1690_v15 = vld [vmem:[#allocation2 + $0x78] sm:$0xff] }
 0x3e2   : > { %630 = vst [vmem:[#allocation2 + $0x98] sm:$0xf0] %v626_v13  ;;  %737 = vmatpush.msra.mxu3 %v1690_v15 }
 0x3e3   : > { %718 = vmatpush.msra.mxu2 %v1696_v17 }
 0x3e4   : > { %738 = vmatpush.msra.mxu3 %v1699_v23  ;;  %v612_v25 = vpop.permute.xlu1 %611 }
 0x3e5   : > { %v613_v28 = vsel %vm352_vm10, %v610_v24, %v612_v25  ;;  %v614_v31 = vsel %vm352_vm10, %v612_v25, %v610_v24  ;;  %v598_v34 = vpop.permute.xlu0 %597 }
 0x3e6   : > { %615 = vst [vmem:[#allocation2 + $0x118] sm:$0xf] %v614_v31  ;;  %v599_v35 = vsel %vm352_vm10, %v596_v8, %v598_v34  ;;  %v600_v36 = vsel %vm352_vm10, %v598_v34, %v596_v8 }
 0x3e7   : > { %616 = vst [vmem:[#allocation2 + $0x98] sm:$0xf] %v613_v28  ;;  %v603_v37 = vrot.slane %v600_v36, 4  ;;  %v604_v38 = vrot.slane %v599_v35, 4 }
 0x3e9   : > { %607 = vst [vmem:[#allocation2 + $0x80] sm:$0xf0] %v603_v37 }
 0x3ea   : > { %608 = vst [vmem:[#allocation2 + $0x110] sm:$0xf0] %v604_v38 }
 0x3ed   : > { %v1713_v40 = vld [vmem:[#allocation2 + $0x118] sm:$0xff]  ;;  %v703_v47 = vpop.permute.xlu0 %702 }
 0x3ee   : > { %719 = vmatpush.msra.mxu2 %v1713_v40  ;;  %v1716_v41 = vld [vmem:[#allocation2 + $0x98] sm:$0xff] }
 0x3ef   : > { %739 = vmatpush.msra.mxu3 %v1716_v41 }
 0x3f0   : > { %v1719_v44 = vld [vmem:[#allocation2 + $0x80] sm:$0xff] }
 0x3f1   : > { %720 = vmatpush.msra.mxu2 %v1719_v44  ;;  %v1722_v45 = vld [vmem:[#allocation2 + $0x110] sm:$0xff] }
 0x3f2   : > { %740 = vmatpush.msra.mxu3 %v1722_v45 }
 0x3f3   : > { %721 = vmatpush.msra.mxu2 %v1579_v18 }
 0x3f4   : > { %741 = vmatpush.msra.mxu3 %v1582_v19 }
 0x3f5   : > { %722 = vmatpush.msra.mxu2 %v1585_v20  ;;  %v785_v11 = vpop.permute.xlu0 %784 }
 0x3f6   : > { %742 = vmatpush.msra.mxu3 %v1588_v22 }
 0x3f7   : > { %723 = vmatpush.msra.mxu2 %v1595_v29 }
 0x3f8   : > { %743 = vmatpush.msra.mxu3 %v1598_v30 }
 0x3f9   : > { %724 = vmatpush.msra.mxu2 %v1604_v32 }
 0x3fa   : > { %744 = vmatpush.msra.mxu3 %v1607_v33  ;;  %1360 = vmatmul.msk.f32.vlgmr.msra.gmra.mxu2 %vm705_vm13, %v679_v46 }
 0x3fb   : > { %1361 = vmatmul.msk.f32.vlgmr.msra.gmra.mxu3 %vm705_vm13, %v679_v46 }
 0x3fd   : > { %v794_v35 = vpop.permute.xlu0 %793 }
 0x47d   : > { %v726_v48 = vpop.f32.mrf.mxu2 }
 0x47e   : > { %v727_v49 = vadd.f32 %v726_v48, %v703_v47  ;;  %v746_v50 = vpop.f32.mrf.mxu3 }
 0x47f   : > { %v747_v51 = vadd.f32 %v746_v50, %v703_v47 }
 0x480   : > { %v749_v53 = vmax.f32 %v727_v49, 0.0 }
 0x481   : > { %v750_v54 = vmax.f32 %v747_v51, 0.0 }
 0x482   : > { %v751_v55 = vsel %vm464_vm12, %v749_v53, 0.0 }
 0x483   : > { %v752_v56 = vsel %vm464_vm12, %v750_v54, 0.0 }
 0x484   : > { %v753_v57 = vadd.f32 %v752_v56, %v751_v55 }
 0x486   : > { %754 = vadd.xlane.f32.xlu2 %v753_v57 }
 0x4f9   : > { %v755_v58 = vpop.xlane.xlu2 %754 }
 0x4fa   : > { %v756_v59 = vmul.f32 %v755_v58, %v1612_v52 }
 0x4fc   : > { %v757_v60 = vsub.f32 %v749_v53, %v756_v59  ;;  %v758_v61 = vsub.f32 %v750_v54, %v756_v59  ;;  %v1364_v59 = vld [vmem:[%s1979_s6 + $0x18] sm:$0xf] }
 0x4fe   : > { %v759_v0 = vmul.f32 %v757_v60, %v757_v60  ;;  %v760_v1 = vmul.f32 %v758_v61, %v758_v61 }
 0x500   : > { %v761_v2 = vsel %vm464_vm12, %v759_v0, 0.0  ;;  %v762_v3 = vsel %vm464_vm12, %v760_v1, 0.0  ;;  %v1369_v0 = vld [vmem:[%s1979_s6 + $0x1c] sm:$0xf] }
 0x501   : > { %v763_v4 = vadd.f32 %v762_v3, %v761_v2 }
 0x503   : > { %764 = vadd.xlane.f32.xlu1 %v763_v4 }
 0x576   : > { %v765_v5 = vpop.xlane.xlu1 %764 }
 0x577   : > { %v766_v6 = vmul.f32 %v765_v5, %v1612_v52 }
 0x579   : > { %v767_v7 = vadd.f32 1e-05, %v766_v6 }
 0x57b   : > { %1401 = vrsqrt.f32 %v767_v7  ;;  %vm774_vm15 = vweird.f32 %v767_v7 }
 0x581   : > { %v1402_v8 = vpop.eup %1401 }
 0x582   : > { %v769_v9 = vmul.f32 %v1402_v8, %v767_v7  ;;  %vm775_vm14 = vweird.f32 %v1402_v8 }
 0x583   : > { %vm776_vm0 = vmor %vm774_vm15, %vm775_vm14 }
 0x584   : > { %v770_v10 = vmul.f32 %v1402_v8, %v769_v9 }
 0x586   : > { %v771_v12 = vmul.f32 0.5, %v770_v10 }
 0x588   : > { %v772_v13 = vsub.f32 1.5, %v771_v12 }
 0x58a   : > { %v773_v16 = vmul.f32 %v1402_v8, %v772_v13 }
 0x58c   : > { %v777_v24 = vsel %vm776_vm0, %v1402_v8, %v773_v16 }
 0x58d   : > { %v778_v25 = vmul.f32 %v777_v24, %v757_v60  ;;  %v779_v28 = vmul.f32 %v777_v24, %v758_v61 }
 0x58f   : > { %v787_v31 = vmul.f32 %v785_v11, %v778_v25  ;;  %v788_v34 = vmul.f32 %v785_v11, %v779_v28  ;;  %v1370_v11 = vld [vmem:[%s1979_s6 + $0x20] sm:$0xf] }
 0x591   : > { %v796_v36 = vadd.f32 %v794_v35, %v787_v31  ;;  %v797_v37 = vadd.f32 %v794_v35, %v788_v34 }
 0x593   : > { %864 = vst [vmem:[#allocation2 + $0xe0] sm:$0xf] %v796_v36  ;;  %820 = vrot.lane.b32.xlu1 %v797_v37, %s1415_s9  ;;  %818 = vrot.lane.b32.xlu2 %v796_v36, %s1415_s9 }
 0x594   : > { %865 = vst [vmem:[#allocation2 + $0x60] sm:$0xf] %v797_v37  ;;  %812 = vrot.lane.b32.xlu0 %v796_v36, %s1414_s8 }
 0x59b   : > { %884 = vrot.lane.b32.xlu1 %v797_v37, %s1418_s12  ;;  %806 = vrot.lane.b32.xlu2 %v797_v37, %s1416_s10 }
 0x59c   : > { %814 = vrot.lane.b32.xlu0 %v797_v37, %s1414_s8 }
 0x5a3   : > { %836 = vrot.lane.b32.xlu1 %v797_v37, %s1417_s11 }
 0x5a4   : > { %798 = vrot.lane.b32.xlu0 %v796_v36, %s1413_s30 }
 0x5ac   : > { %800 = vrot.lane.b32.xlu0 %v797_v37, %s1413_s30 }
 0x5b4   : > { %804 = vrot.lane.b32.xlu0 %v796_v36, %s1416_s10 }
 0x5bc   : > { %882 = vrot.lane.b32.xlu0 %v796_v36, %s1418_s12 }
 0x5c4   : > { %834 = vrot.lane.b32.xlu0 %v796_v36, %s1417_s11 }
 0x5ed   : > { %v819_v46 = vpop.permute.xlu2 %818 }
 0x5f5   : > { %v807_v60 = vpop.permute.xlu2 %806 }
 0x605   : > { %v821_v39 = vpop.permute.xlu1 %820 }
 0x606   : > { %v813_v38 = vpop.permute.xlu0 %812  ;;  %v822_v48 = vsel %vm338_vm3, %v819_v46, %v821_v39  ;;  %v823_v49 = vsel %vm338_vm3, %v821_v39, %v819_v46 }
 0x60d   : > { %v885_v9 = vpop.permute.xlu1 %884 }
 0x60e   : > { %v815_v47 = vpop.permute.xlu0 %814 }
 0x60f   : > { %v816_v50 = vsel %vm326_vm2, %v813_v38, %v815_v47  ;;  %v817_v51 = vsel %vm326_vm2, %v815_v47, %v813_v38 }
 0x610   : > { %v824_v53 = vsel %vm1500_vm5, %v817_v51, %v822_v48  ;;  %v825_v54 = vsel %vm1496_vm4, %v816_v50, %v823_v49 }
 0x611   : > { %896 = vrot.lane.b32.xlu2 %v824_v53, %s1418_s12  ;;  %v868_v55 = vrot.slane %v824_v53, 4  ;;  %898 = vrot.lane.b32.xlu0 %v825_v54, %s1418_s12  ;;  %v869_v56 = vrot.slane %v825_v54, 4 }
 0x613   : > { %872 = vst [vmem:[#allocation2 + $0xe0] sm:$0xf0] %v868_v55 }
 0x614   : > { %873 = vst [vmem:[#allocation2 + $0x60] sm:$0xf0] %v869_v56 }
 0x615   : > { %v837_v25 = vpop.permute.xlu1 %836 }
 0x616   : > { %v799_v57 = vpop.permute.xlu0 %798 }
 0x619   : > { %850 = vrot.lane.b32.xlu0 %v825_v54, %s1417_s11 }
 0x61e   : > { %v801_v58 = vpop.permute.xlu0 %800 }
 0x61f   : > { %v802_v1 = vsel %vm295_vm6, %v799_v57, %v801_v58  ;;  %v803_v2 = vsel %vm295_vm6, %v801_v58, %v799_v57 }
 0x621   : > { %937 = vperm.xlu0 %1395, %v1364_v59  }
 0x626   : > { %v805_v61 = vpop.permute.xlu0 %804 }
 0x627   : > { %v808_v3 = vsel %vm307_vm7, %v805_v61, %v807_v60  ;;  %v809_v4 = vsel %vm307_vm7, %v807_v60, %v805_v61 }
 0x628   : > { %v810_v5 = vsel %vm1523_vm9, %v802_v1, %v809_v4  ;;  %v811_v6 = vsel %vm1519_vm8, %v803_v2, %v808_v3  ;;  %v1827_v2 = vld [vmem:[#allocation2 + $0xe0] sm:$0xff] }
 0x629   : > { %1025 = vperm.xlu0 %1395, %v1369_v0   ;;  %874 = vrot.lane.b32.xlu1 %v810_v5, %s1418_s12  ;;  %v858_v7 = vrot.slane %v810_v5, 4  ;;  %v859_v8 = vrot.slane %v811_v6, 4  ;;  %v1830_v3 = vld [vmem:[#allocation2 + $0x60] sm:$0xff] }
 0x62a   : > { %876 = vrot.lane.b32.xlu2 %v811_v6, %s1418_s12 }
 0x62b   : > { %862 = vst [vmem:[#allocation2 + $0x70] sm:$0xf0] %v858_v7 }
 0x62c   : > { %863 = vst [vmem:[#allocation2 + $0x58] sm:$0xf0] %v859_v8  ;;  %v904_v8 = vld [vmem:[%s1977_s4] sm:$0xf] }
 0x62e   : > { %v883_v10 = vpop.permute.xlu0 %882 }
 0x62f   : > { %v886_v12 = vsel %vm411_vm11, %v883_v10, %v885_v9  ;;  %v887_v13 = vsel %vm411_vm11, %v885_v9, %v883_v10 }
 0x630   : > { %v890_v16 = vrot.slane %v886_v12, 4  ;;  %v891_v24 = vrot.slane %v887_v13, 4 }
 0x631   : > { %1034 = vperm.xlu0 %1395, %v1370_v11   ;;  %826 = vrot.lane.b32.xlu1 %v810_v5, %s1417_s11 }
 0x632   : > { %894 = vst [vmem:[#allocation2 + $0xa8] sm:$0xf0] %v890_v16  ;;  %848 = vrot.lane.b32.xlu2 %v824_v53, %s1417_s11 }
 0x633   : > { %895 = vst [vmem:[#allocation2 + $0x88] sm:$0xf0] %v891_v24 }
 0x636   : > { %v835_v28 = vpop.permute.xlu0 %834 }
 0x637   : > { %v838_v31 = vsel %vm352_vm10, %v835_v28, %v837_v25  ;;  %v839_v34 = vsel %vm352_vm10, %v837_v25, %v835_v28 }
 0x638   : > { %v842_v35 = vrot.slane %v839_v34, 4  ;;  %v843_v36 = vrot.slane %v838_v31, 4 }
 0x63a   : > { %846 = vst [vmem:[#allocation2 + $0x90] sm:$0xf0] %v842_v35  ;;  %828 = vrot.lane.b32.xlu2 %v811_v6, %s1417_s11 }
 0x63b   : > { %847 = vst [vmem:[#allocation2 + $0xa0] sm:$0xf0] %v843_v36 }
 0x66b   : > { %v897_v37 = vpop.permute.xlu2 %896 }
 0x683   : > { %v899_v38 = vpop.permute.xlu0 %898 }
 0x684   : > { %v877_v39 = vpop.permute.xlu2 %876  ;;  %v900_v46 = vsel %vm411_vm11, %v897_v37, %v899_v38  ;;  %v901_v47 = vsel %vm411_vm11, %v899_v38, %v897_v37 }
 0x685   : > { %902 = vst [vmem:[#allocation2 + $0xd8] sm:$0xf] %v900_v46 }
 0x686   : > { %903 = vst [vmem:[#allocation2 + $0xc0] sm:$0xf] %v901_v47 }
 0x68b   : > { %v851_v48 = vpop.permute.xlu0 %850 }
 0x68c   : > { %v849_v49 = vpop.permute.xlu2 %848  ;;  %v931_v50 = vld [vmem:[#allocation2 + $0xd8] sm:$0xf] }
 0x68d   : > { %v852_v51 = vsel %vm352_vm10, %v849_v49, %v851_v48  ;;  %v853_v53 = vsel %vm352_vm10, %v851_v48, %v849_v49  ;;  %1365 = vmatpush.msk.msrb.mxu0 %vm464_vm12, %v931_v50  ;;  %v932_v54 = vld [vmem:[#allocation2 + $0xc0] sm:$0xf] }
 0x68e   : > { %854 = vst [vmem:[#allocation2 + $0x70] sm:$0xf] %v853_v53  ;;  %1367 = vmatpush.msk.msrb.mxu1 %vm464_vm12, %v932_v54 }
 0x68f   : > { %855 = vst [vmem:[#allocation2 + $0x58] sm:$0xf] %v852_v51 }
 0x694   : > { %v829_v58 = vpop.permute.xlu2 %828 }
 0x695   : > { %v1833_v4 = vld [vmem:[#allocation2 + $0x70] sm:$0xff] }
 0x696   : > { %v1836_v5 = vld [vmem:[#allocation2 + $0x58] sm:$0xff] }
 0x69b   : > { %v875_v55 = vpop.permute.xlu1 %874 }
 0x69c   : > { %v878_v56 = vsel %vm411_vm11, %v875_v55, %v877_v39  ;;  %v879_v57 = vsel %vm411_vm11, %v877_v39, %v875_v55 }
 0x69d   : > { %880 = vst [vmem:[#allocation2 + $0xa8] sm:$0xf] %v878_v56 }
 0x69e   : > { %881 = vst [vmem:[#allocation2 + $0x88] sm:$0xf] %v879_v57 }
 0x6a3   : > { %v827_v59 = vpop.permute.xlu1 %826 }
 0x6a4   : > { %v830_v60 = vsel %vm352_vm10, %v827_v59, %v829_v58  ;;  %v831_v61 = vsel %vm352_vm10, %v829_v58, %v827_v59  ;;  %v1821_v0 = vld [vmem:[#allocation2 + $0xa8] sm:$0xff] }
 0x6a5   : > { %832 = vst [vmem:[#allocation2 + $0x90] sm:$0xf] %v831_v61  ;;  %953 = vmatpush.msrb.mxu0 %v1821_v0  ;;  %v1824_v1 = vld [vmem:[#allocation2 + $0x88] sm:$0xff] }
 0x6a6   : > { %833 = vst [vmem:[#allocation2 + $0xa0] sm:$0xf] %v830_v60  ;;  %973 = vmatpush.msrb.mxu1 %v1824_v1 }
 0x6a7   : > { %954 = vmatpush.msrb.mxu0 %v1827_v2 }
 0x6a8   : > { %974 = vmatpush.msrb.mxu1 %v1830_v3 }
 0x6a9   : > { %955 = vmatpush.msrb.mxu0 %v1833_v4 }
 0x6aa   : > { %975 = vmatpush.msrb.mxu1 %v1836_v5 }
 0x6ac   : > { %v1839_v6 = vld [vmem:[#allocation2 + $0x90] sm:$0xff] }
 0x6ad   : > { %956 = vmatpush.msrb.mxu0 %v1839_v6  ;;  %v1842_v7 = vld [vmem:[#allocation2 + $0xa0] sm:$0xff] }
 0x6ae   : > { %976 = vmatpush.msrb.mxu1 %v1842_v7 }
 0x6af   : > { %957 = vmatpush.msrb.mxu0 %v1670_v62 }
 0x6b0   : > { %977 = vmatpush.msrb.mxu1 %v1673_v63 }
 0x6b1   : > { %958 = vmatpush.msrb.mxu0 %v1687_v14 }
 0x6b2   : > { %978 = vmatpush.msrb.mxu1 %v1690_v15 }
 0x6b3   : > { %959 = vmatpush.msrb.mxu0 %v1696_v17 }
 0x6b4   : > { %979 = vmatpush.msrb.mxu1 %v1699_v23 }
 0x6b5   : > { %960 = vmatpush.msrb.mxu0 %v1713_v40 }
 0x6b6   : > { %980 = vmatpush.msrb.mxu1 %v1716_v41 }
 0x6b7   : > { %961 = vmatpush.msrb.mxu0 %v1719_v44 }
 0x6b8   : > { %981 = vmatpush.msrb.mxu1 %v1722_v45 }
 0x6b9   : > { %962 = vmatpush.msrb.mxu0 %v1579_v18  ;;  %v938_v18 = vpop.permute.xlu0 %937 }
 0x6ba   : > { %982 = vmatpush.msrb.mxu1 %v1582_v19 }
 0x6bb   : > { %963 = vmatpush.msrb.mxu0 %v1585_v20 }
 0x6bc   : > { %983 = vmatpush.msrb.mxu1 %v1588_v22 }
 0x6bd   : > { %964 = vmatpush.msrb.mxu0 %v1595_v29 }
 0x6be   : > { %984 = vmatpush.msrb.mxu1 %v1598_v30 }
 0x6bf   : > { %965 = vmatpush.msrb.mxu0 %v1604_v32 }
 0x6c0   : > { %985 = vmatpush.msrb.mxu1 %v1607_v33  ;;  %1366 = vmatmul.msk.f32.vlgmr.msrb.gmra.mxu0 %vm940_vm1, %v904_v8 }
 0x6c1   : > { %1368 = vmatmul.msk.f32.vlgmr.msrb.gmra.mxu1 %vm940_vm1, %v904_v8  ;;  %v1026_v47 = vpop.permute.xlu0 %1025 }
 0x6c9   : > { %v1035_v57 = vpop.permute.xlu0 %1034 }
 0x73d   : > { %v967_v19 = vpop.f32.mrf.mxu0 }
 0x73e   : > { %v968_v20 = vadd.f32 %v967_v19, %v938_v18  ;;  %v987_v9 = vpop.f32.mrf.mxu1 }
 0x73f   : > { %v988_v22 = vadd.f32 %v987_v9, %v938_v18 }
 0x740   : > { %v990_v10 = vmax.f32 %v968_v20, 0.0 }
 0x741   : > { %v991_v29 = vmax.f32 %v988_v22, 0.0 }
 0x742   : > { %v992_v11 = vsel %vm464_vm12, %v990_v10, 0.0 }
 0x743   : > { %v993_v12 = vsel %vm464_vm12, %v991_v29, 0.0 }
 0x744   : > { %v994_v13 = vadd.f32 %v993_v12, %v992_v11 }
 0x746   : > { %995 = vadd.xlane.f32.xlu1 %v994_v13 }
 0x7b9   : > { %v996_v30 = vpop.xlane.xlu1 %995 }
 0x7ba   : > { %v997_v32 = vmul.f32 %v996_v30, %v1612_v52 }
 0x7bc   : > { %v998_v16 = vsub.f32 %v990_v10, %v997_v32  ;;  %v999_v33 = vsub.f32 %v991_v29, %v997_v32 }
 0x7be   : > { %v1000_v24 = vmul.f32 %v998_v16, %v998_v16  ;;  %v1001_v25 = vmul.f32 %v999_v33, %v999_v33 }
 0x7c0   : > { %v1002_v28 = vsel %vm464_vm12, %v1000_v24, 0.0  ;;  %v1003_v31 = vsel %vm464_vm12, %v1001_v25, 0.0 }
 0x7c1   : > { %v1004_v34 = vadd.f32 %v1003_v31, %v1002_v28 }
 0x7c3   : > { %1005 = vadd.xlane.f32.xlu2 %v1004_v34 }
 0x836   : > { %v1006_v35 = vpop.xlane.xlu2 %1005 }
 0x837   : > { %v1007_v36 = vmul.f32 %v1006_v35, %v1612_v52 }
 0x839   : > { %v1008_v37 = vadd.f32 1e-05, %v1007_v36 }
 0x83b   : > { %1403 = vrsqrt.f32 %v1008_v37  ;;  %vm1015_vm14 = vweird.f32 %v1008_v37 }
 0x841   : > { %v1404_v38 = vpop.eup %1403 }
 0x842   : > { %v1010_v39 = vmul.f32 %v1404_v38, %v1008_v37  ;;  %vm1016_vm13 = vweird.f32 %v1404_v38 }
 0x843   : > { %vm1017_vm15 = vmor %vm1015_vm14, %vm1016_vm13 }
 0x844   : > { %v1011_v46 = vmul.f32 %v1404_v38, %v1010_v39 }
 0x846   : > { %v1012_v48 = vmul.f32 0.5, %v1011_v46 }
 0x848   : > { %v1013_v49 = vsub.f32 1.5, %v1012_v48 }
 0x84a   : > { %v1014_v50 = vmul.f32 %v1404_v38, %v1013_v49 }
 0x84c   : > { %v1018_v51 = vsel %vm1017_vm15, %v1404_v38, %v1014_v50 }
 0x84d   : > { %v1019_v53 = vmul.f32 %v1018_v51, %v998_v16  ;;  %v1020_v54 = vmul.f32 %v1018_v51, %v999_v33 }
 0x84f   : > { %v1028_v55 = vmul.f32 %v1026_v47, %v1019_v53  ;;  %v1029_v56 = vmul.f32 %v1026_v47, %v1020_v54  ;;  %v1151_v53 = vld [vmem:[%s1978_s5] sm:$0xff] }
 0x850   : > { %1196 = vst [vmem:[#allocation1] ss:$2 sm:$0xff] %v1151_v53 }
 0x851   : > { %v1037_v58 = vadd.f32 %v1035_v57, %v1028_v55  ;;  %v1038_v52 = vadd.f32 %v1035_v57, %v1029_v56 }
 0x853   : > { %1061 = vrot.lane.b32.xlu1 %v1038_v52, %s1415_s9  ;;  %1039 = vrot.lane.b32.xlu2 %v1037_v58, %s1413_s30  ;;  %v1107_v59 = vrot.slane %v1037_v58, 4  ;;  %v1108_v60 = vrot.slane %v1038_v52, 4 }
 0x854   : > { %1053 = vrot.lane.b32.xlu0 %v1037_v58, %s1414_s8 }
 0x855   : > { %1111 = vst [vmem:[#allocation2 + $0xb8] sm:$0xf0] %v1107_v59 }
 0x856   : > { %1112 = vst [vmem:[#allocation2 + $0x28] sm:$0xf0] %v1108_v60 }
 0x85c   : > { %1055 = vrot.lane.b32.xlu0 %v1038_v52, %s1414_s8 }
 0x864   : > { %1059 = vrot.lane.b32.xlu0 %v1037_v58, %s1415_s9 }
 0x86c   : > { %1041 = vrot.lane.b32.xlu0 %v1038_v52, %s1413_s30 }
 0x874   : > { %1045 = vrot.lane.b32.xlu0 %v1037_v58, %s1416_s10 }
 0x87c   : > { %1047 = vrot.lane.b32.xlu0 %v1038_v52, %s1416_s10 }
 0x8ad   : > { %v1040_v30 = vpop.permute.xlu2 %1039 }
 0x8c5   : > { %v1062_v18 = vpop.permute.xlu1 %1061 }
 0x8c6   : > { %v1054_v61 = vpop.permute.xlu0 %1053 }
 0x8ce   : > { %v1056_v8 = vpop.permute.xlu0 %1055 }
 0x8cf   : > { %v1057_v20 = vsel %vm326_vm2, %v1054_v61, %v1056_v8  ;;  %v1058_v9 = vsel %vm326_vm2, %v1056_v8, %v1054_v61  ;;  %vm1200_vm2 = vcmask 130048  }
 0x8d6   : > { %v1060_v19 = vpop.permute.xlu0 %1059 }
 0x8d7   : > { %v1063_v22 = vsel %vm338_vm3, %v1060_v19, %v1062_v18  ;;  %v1064_v10 = vsel %vm338_vm3, %v1062_v18, %v1060_v19  ;;  %v1371_v19 = vld [vmem:[%s1979_s6 + $0x24] sm:$0xf] }
 0x8d8   : > { %v1066_v29 = vsel %vm1496_vm4, %v1057_v20, %v1064_v10  ;;  %v1065_v11 = vsel %vm1500_vm5, %v1058_v9, %v1063_v22 }
 0x8d9   : > { %1091 = vrot.lane.b32.xlu2 %v1066_v29, %s1417_s11  ;;  %1114 = vst [vmem:[#allocation2] sm:$0xf] %v1066_v29  ;;  %1089 = vrot.lane.b32.xlu1 %v1065_v11, %s1417_s11 }
 0x8da   : > { %1113 = vst [vmem:[#allocation2 + $0x100] sm:$0xf] %v1065_v11 }
 0x8de   : > { %v1042_v12 = vpop.permute.xlu0 %1041 }
 0x8df   : > { %v1043_v26 = vsel %vm295_vm6, %v1040_v30, %v1042_v12  ;;  %v1044_v27 = vsel %vm295_vm6, %v1042_v12, %v1040_v30 }
 0x8e1   : > { %1081 = vrot.lane.b32.xlu2 %v1037_v58, %s1417_s11 }
 0x8e6   : > { %v1046_v13 = vpop.permute.xlu0 %1045 }
 0x8e9   : > { %1139 = vrot.lane.b32.xlu2 %v1066_v29, %s1418_s12 }
 0x8ee   : > { %v1048_v32 = vpop.permute.xlu0 %1047 }
 0x8ef   : > { %v1049_v16 = vsel %vm307_vm7, %v1046_v13, %v1048_v32  ;;  %v1050_v33 = vsel %vm307_vm7, %v1048_v32, %v1046_v13 }
 0x8f0   : > { %v1051_v24 = vsel %vm1523_vm9, %v1043_v26, %v1050_v33  ;;  %v1052_v25 = vsel %vm1519_vm8, %v1044_v27, %v1049_v16 }
 0x8f1   : > { %1129 = vrot.lane.b32.xlu2 %v1037_v58, %s1418_s12  ;;  %1067 = vrot.lane.b32.xlu0 %v1051_v24, %s1417_s11  ;;  %1103 = vst [vmem:[#allocation2 + $0xb8] sm:$0xf] %v1051_v24 }
 0x8f2   : > { %1069 = vrot.lane.b32.xlu1 %v1052_v25, %s1417_s11  ;;  %1104 = vst [vmem:[#allocation2 + $0x28] sm:$0xf] %v1052_v25 }
 0x8f8   : > { %v1182_v28 = vld [vmem:[#allocation2 + $0xb8] sm:$0xff] }
 0x8f9   : > { %1083 = vrot.lane.b32.xlu0 %v1038_v52, %s1417_s11  ;;  %1203 = vmatpush.msrb.mxu2 %v1182_v28  ;;  %v1183_v31 = vld [vmem:[#allocation2 + $0x28] sm:$0xff] }
 0x8fa   : > { %1137 = vrot.lane.b32.xlu1 %v1065_v11, %s1418_s12  ;;  %1243 = vmatpush.msrb.mxu3 %v1183_v31 }
 0x901   : > { %1115 = vrot.lane.b32.xlu0 %v1051_v24, %s1418_s12 }
 0x902   : > { %1117 = vrot.lane.b32.xlu1 %v1052_v25, %s1418_s12 }
 0x909   : > { %1131 = vrot.lane.b32.xlu0 %v1038_v52, %s1418_s12 }
 0x90a   : > { %1192 = vperm.xlu1 %1396, %v1371_v19  }
 0x933   : > { %v1092_v42 = vpop.permute.xlu2 %1091 }
 0x93b   : > { %v1082_v38 = vpop.permute.xlu2 %1081 }
 0x943   : > { %v1140_v54 = vpop.permute.xlu2 %1139 }
 0x94b   : > { %v1090_v43 = vpop.permute.xlu1 %1089  ;;  %v1130_v13 = vpop.permute.xlu2 %1129 }
 0x94c   : > { %v1093_v34 = vsel %vm352_vm10, %v1090_v43, %v1092_v42  ;;  %v1094_v35 = vsel %vm352_vm10, %v1092_v42, %v1090_v43 }
 0x94d   : > { %v1097_v36 = vrot.slane %v1094_v35, 4  ;;  %v1098_v37 = vrot.slane %v1093_v34, 4 }
 0x94f   : > { %1101 = vst [vmem:[#allocation2 + $0x50] sm:$0xf0] %v1097_v36 }
 0x950   : > { %1102 = vst [vmem:[#allocation2 + $0xf0] sm:$0xf0] %v1098_v37 }
 0x963   : > { %v1068_v39 = vpop.permute.xlu0 %1067 }
 0x964   : > { %v1070_v46 = vpop.permute.xlu1 %1069 }
 0x965   : > { %v1071_v47 = vsel %vm352_vm10, %v1068_v39, %v1070_v46  ;;  %v1072_v48 = vsel %vm352_vm10, %v1070_v46, %v1068_v39 }
 0x966   : > { %v1075_v49 = vrot.slane %v1072_v48, 4  ;;  %v1076_v50 = vrot.slane %v1071_v47, 4 }
 0x968   : > { %1079 = vst [vmem:[#allocation2 + $0xd8] sm:$0xf0] %v1075_v49 }
 0x969   : > { %1080 = vst [vmem:[#allocation2 + $0xc0] sm:$0xf0] %v1076_v50 }
 0x96b   : > { %v1084_v51 = vpop.permute.xlu0 %1083 }
 0x96c   : > { %v1085_v55 = vsel %vm352_vm10, %v1082_v38, %v1084_v51  ;;  %v1086_v56 = vsel %vm352_vm10, %v1084_v51, %v1082_v38  ;;  %v1138_v57 = vpop.permute.xlu1 %1137 }
 0x96d   : > { %1087 = vst [vmem:[#allocation2 + $0x50] sm:$0xf] %v1086_v56  ;;  %v1141_v58 = vsel %vm411_vm11, %v1138_v57, %v1140_v54  ;;  %v1142_v52 = vsel %vm411_vm11, %v1140_v54, %v1138_v57 }
 0x96e   : > { %1088 = vst [vmem:[#allocation2 + $0xf0] sm:$0xf] %v1085_v55  ;;  %v1145_v59 = vrot.slane %v1141_v58, 4  ;;  %v1146_v60 = vrot.slane %v1142_v52, 4 }
 0x96f   : > { %v1178_v11 = vld [vmem:[#allocation2 + $0xd8] sm:$0xff] }
 0x970   : > { %1149 = vst [vmem:[#allocation2 + $0x40] sm:$0xf0] %v1145_v59  ;;  %v1179_v12 = vld [vmem:[#allocation2 + $0xc0] sm:$0xff] }
 0x971   : > { %1150 = vst [vmem:[#allocation2 + $0xe8] sm:$0xf0] %v1146_v60 }
 0x973   : > { %v1116_v61 = vpop.permute.xlu0 %1115 }
 0x974   : > { %v1118_v8 = vpop.permute.xlu1 %1117  ;;  %v1180_v18 = vld [vmem:[#allocation2 + $0x50] sm:$0xff] }
 0x975   : > { %v1119_v20 = vsel %vm411_vm11, %v1116_v61, %v1118_v8  ;;  %v1120_v9 = vsel %vm411_vm11, %v1118_v8, %v1116_v61  ;;  %1204 = vmatpush.msrb.mxu2 %v1180_v18  ;;  %v1181_v22 = vld [vmem:[#allocation2 + $0xf0] sm:$0xff] }
 0x976   : > { %v1123_v10 = vrot.slane %v1119_v20, 4  ;;  %v1124_v29 = vrot.slane %v1120_v9, 4  ;;  %1244 = vmatpush.msrb.mxu3 %v1181_v22 }
 0x977   : > { %1205 = vmatpush.msrb.mxu2 %v1178_v11 }
 0x978   : > { %1127 = vst [vmem:[#allocation2 + $0x100] sm:$0xf0] %v1123_v10  ;;  %1245 = vmatpush.msrb.mxu3 %v1179_v12 }
 0x979   : > { %1128 = vst [vmem:[#allocation2] sm:$0xf0] %v1124_v29  ;;  %1206 = vmatpush.msrb.mxu2 %v1821_v0 }
 0x97a   : > { %1246 = vmatpush.msrb.mxu3 %v1824_v1 }
 0x97b   : > { %v1132_v30 = vpop.permute.xlu0 %1131  ;;  %1207 = vmatpush.msrb.mxu2 %v1827_v2  ;;  %v1198_v2 = vld.sshfl [vmem:[#allocation1 + $0x8] sm:$0xff pattern:$0x75316420] }
 0x97c   : > { %v1133_v32 = vsel %vm411_vm11, %v1130_v13, %v1132_v30  ;;  %v1134_v26 = vsel %vm411_vm11, %v1132_v30, %v1130_v13  ;;  %1247 = vmatpush.msrb.mxu3 %v1830_v3  ;;  %v1197_v3 = vld.sshfl [vmem:[#allocation1] sm:$0xff pattern:$0x75316420] }
 0x97d   : > { %1135 = vst [vmem:[#allocation2 + $0x40] sm:$0xf] %v1133_v32  ;;  %1208 = vmatpush.msrb.mxu2 %v1833_v4 }
 0x97e   : > { %1136 = vst [vmem:[#allocation2 + $0xe8] sm:$0xf] %v1134_v26  ;;  %1248 = vmatpush.msrb.mxu3 %v1836_v5 }
 0x97f   : > { %1209 = vmatpush.msrb.mxu2 %v1839_v6  ;;  %v1184_v1 = vld [vmem:[#allocation2 + $0x100] sm:$0xff] }
 0x980   : > { %1249 = vmatpush.msrb.mxu3 %v1842_v7 }
 0x981   : > { %1210 = vmatpush.msrb.mxu2 %v1670_v62  ;;  %v1185_v62 = vld [vmem:[#allocation2] sm:$0xff] }
 0x982   : > { %1250 = vmatpush.msrb.mxu3 %v1673_v63  ;;  %v1158_v63 = vld [vmem:[#allocation2 + $0x30] sm:$0xff] }
 0x983   : > { %1211 = vmatpush.msrb.mxu2 %v1687_v14  ;;  %v1159_v14 = vld [vmem:[#allocation2 + $0x18] sm:$0xff] }
 0x984   : > { %1251 = vmatpush.msrb.mxu3 %v1690_v15  ;;  %v1186_v21 = vld [vmem:[#allocation2 + $0x40] sm:$0xff]  ;;  %v1156_v15 = vld [vmem:[#allocation2 + $0x108] sm:$0xff] }
 0x985   : > { %1212 = vmatpush.msrb.mxu2 %v1696_v17  ;;  %1237 = vmatpush.msra.mxu1 %v1186_v21  ;;  %v1187_v0 = vld [vmem:[#allocation2 + $0xe8] sm:$0xff] }
 0x986   : > { %1252 = vmatpush.msrb.mxu3 %v1699_v23  ;;  %1277 = vmatpush.msra.mxu0 %v1187_v0  ;;  %v1157_v17 = vld [vmem:[#allocation2 + $0x68] sm:$0xff]  ;;  %v1154_v23 = vld [vmem:[#allocation2 + $0x10] sm:$0xff] }
 0x987   : > { %1213 = vmatpush.msrb.mxu2 %v1713_v40  ;;  %1238 = vmatpush.msra.mxu1 %v1184_v1  ;;  %v1155_v40 = vld [vmem:[#allocation2 + $0x48] sm:$0xff] }
 0x988   : > { %1253 = vmatpush.msrb.mxu3 %v1716_v41  ;;  %1278 = vmatpush.msra.mxu0 %v1185_v62  ;;  %v1152_v41 = vld [vmem:[#allocation2 + $0xb0] sm:$0xff] }
 0x989   : > { %1214 = vmatpush.msrb.mxu2 %v1719_v44  ;;  %1372 = vmatmul.msk.f32.vlgmr.msra.gmra.mxu1 %vm1200_vm2, %v1198_v2  ;;  %v1153_v44 = vld [vmem:[#allocation2 + $0xd0] sm:$0xff] }
 0x98a   : > { %1254 = vmatpush.msrb.mxu3 %v1722_v45  ;;  %1373 = vmatmul.msk.f32.vlgmr.msra.gmra.mxu0 %vm1200_vm2, %v1198_v2  ;;  %v1193_v45 = vpop.permute.xlu1 %1192 }
 0x98b   : > { %1215 = vmatpush.msrb.mxu2 %v1158_v63 }
 0x98c   : > { %1255 = vmatpush.msrb.mxu3 %v1159_v14 }
 0x98d   : > { %1216 = vmatpush.msrb.mxu2 %v1156_v15 }
 0x98e   : > { %1256 = vmatpush.msrb.mxu3 %v1157_v17 }
 0x98f   : > { %1217 = vmatpush.msrb.mxu2 %v1154_v23 }
 0x990   : > { %1257 = vmatpush.msrb.mxu3 %v1155_v40 }
 0x991   : > { %1218 = vmatpush.msrb.mxu2 %v1152_v41 }
 0x992   : > { %1258 = vmatpush.msrb.mxu3 %v1153_v44  ;;  %1219 = vmatmul.f32.vlgmr.msrb.gmra.mxu2 %v1197_v3 }
 0x993   : > { %1259 = vmatmul.f32.vlgmr.msrb.gmra.mxu3 %v1197_v3 }
 0xa06   : > { %v1240_v16 = vpop.f32.mrf.mxu1 }
 0xa07   : > { %v1280_v6 = vpop.f32.mrf.mxu0 }
 0xa15   : > { %v1220_v4 = vpop.f32.mrf.mxu2 }
 0xa16   : > { %v1260_v5 = vpop.f32.mrf.mxu3  ;;  %v1221_v7 = vadd.f32 %v1220_v4, %v1193_v45 }
 0xa17   : > { %v1261_v27 = vadd.f32 %v1260_v5, %v1193_v45 }
 0xa18   : > { %v1241_v24 = vadd.f32 %v1240_v16, %v1221_v7 }
 0xa19   : > { %v1281_v33 = vadd.f32 %v1280_v6, %v1261_v27 }
 0xa1b   : > { %v1285_v25 = vrot.slane %v1281_v33, 4 }
 0xa1d   : > { %v1286_v28 = vsel %vm464_vm12, %v1241_v24, %v1285_v25 }
 0xa1e   : > { %1288 = vst [vmem:[%s278_s28] sm:$0xff] %v1286_v28 }
 0xa1f PF: > { %s17_s24 = sadd.s32 1, %s1411_s24  }
 0xa20   : > { %p14_p4 = scmp.ge.s32.totalorder %s17_s24, 4  }
 0xa22   :  { %16 = sbr.rel (!%p14_p4) target bundleno = 1 (0x1), region = 87 }

</bundles_post_ra>
